<compile_context>
chip_gen: v7x
topology: tpu7x:2x2x1
jax: 0.10.0
libtpu: 0.0.40
codegen_flags: <defaults>
</compile_context>

<pallas_src>
import functools

import numpy as np

import jax
import jax.numpy as jnp
from jax.experimental import pallas as pl
from jax.experimental.pallas import tpu as pltpu


GROWTH = 24          # DenseBlock growth per conv
ND = 16              # number of decoder branches


# --------------------------------------------------------------------------
# Generation-dependent sizing
# --------------------------------------------------------------------------
def _tpu_vmem_capacity():
    try:
        return int(getattr(pltpu.get_tpu_info(), "vmem_capacity_bytes",
                           64 * 1024 * 1024))
    except Exception:
        return 64 * 1024 * 1024


_VMEM_CAP = _tpu_vmem_capacity()
_BIG_VMEM = _VMEM_CAP >= 96 * 1024 * 1024          # v5e / v6e (128 MiB)
VMEM_LIMIT = min((_VMEM_CAP * 3) // 4, 100 * 1024 * 1024)
MAX_TM = 1024 if _BIG_VMEM else 512                # rows per matmul tile
MAX_TN_FULL = 768                                  # keep N whole up to this
TN_TILE = 512 if _BIG_VMEM else 256


def _cp(n_axes):
    return pltpu.CompilerParams(
        dimension_semantics=("parallel",) * n_axes,
        vmem_limit_bytes=VMEM_LIMIT,
    )


# --------------------------------------------------------------------------
# In-kernel helpers
# --------------------------------------------------------------------------
def _shift_down(a):
    """b[0]=0, b[i]=a[i-1]  (narrow f32 accumulator shift)."""
    L = a.shape[0]
    if L == 1:
        return jnp.zeros_like(a)
    z = jnp.zeros((1, a.shape[1]), a.dtype)
    return jnp.concatenate([z, a[:L - 1]], axis=0)


def _shift_up(a):
    """b[L-1]=0, b[i]=a[i+1]."""
    L = a.shape[0]
    if L == 1:
        return jnp.zeros_like(a)
    z = jnp.zeros((1, a.shape[1]), a.dtype)
    return jnp.concatenate([a[1:], z], axis=0)


def _conv3(x, w_ref, b_ref):
    """'same' 3-tap conv of an (L, K) value against a (3, K, N) weight ref.

    Unshifted wide operand into the MXU; boundary shifts applied to the
    narrow f32 accumulators.
    """
    a0 = jnp.dot(x, w_ref[0], preferred_element_type=jnp.float32)
    a1 = jnp.dot(x, w_ref[1], preferred_element_type=jnp.float32)
    a2 = jnp.dot(x, w_ref[2], preferred_element_type=jnp.float32)
    return a1 + _shift_down(a0) + _shift_up(a2) + b_ref[...]


def _grow(s_ref, growth, c0):
    """Apply 4 dense-block growth convs in place on the (L, Ctot) VMEM scratch."""
    c = c0
    for w_ref, b_ref in growth:
        n = w_ref.shape[-1]
        y = _conv3(s_ref[:, :c], w_ref, b_ref)
        s_ref[:, c:c + n] = y.astype(s_ref.dtype)
        c += n
    return c


def _skip_pre(a_ref, c_ref, wa_ref, wb_ref, bp_ref, s_ref):
    """skip layer: concat(A, B) @ W  ==  A @ Wa + B @ Wb  (+bias, ReLU)."""
    c0 = wa_ref.shape[-1]
    pre = (jnp.dot(a_ref[...], wa_ref[...], preferred_element_type=jnp.float32)
           + jnp.dot(c_ref[...], wb_ref[...], preferred_element_type=jnp.float32)
           + bp_ref[...])
    s_ref[:, :c0] = jnp.maximum(pre, 0.0).astype(s_ref.dtype)
    return c0


# --------------------------------------------------------------------------
# Kernels
# --------------------------------------------------------------------------
def _enc_head_kernel(x_ref, wp_ref, bp_ref,
                     w0, b0, w1, b1, w2, b2, w3, b3, o_ref, s_ref):
    """first_conv (k=3 + ReLU) fused with DenseBD1."""
    c0 = wp_ref.shape[-1]
    pre = _conv3(x_ref[...], wp_ref, bp_ref)
    s_ref[:, :c0] = jnp.maximum(pre, 0.0).astype(s_ref.dtype)
    _grow(s_ref, ((w0, b0), (w1, b1), (w2, b2), (w3, b3)), c0)
    o_ref[...] = jnp.maximum(s_ref[...], 0.0).astype(o_ref.dtype)


def _dense_block_kernel(x_ref, w0, b0, w1, b1, w2, b2, w3, b3, o_ref, s_ref):
    """Plain DenseBlock: input copied into scratch, 4 growth convs, ReLU out."""
    c0 = x_ref.shape[-1]
    s_ref[:, :c0] = x_ref[...]
    _grow(s_ref, ((w0, b0), (w1, b1), (w2, b2), (w3, b3)), c0)
    o_ref[...] = jnp.maximum(s_ref[...], 0.0).astype(o_ref.dtype)


def _skip_dense_kernel(a_ref, c_ref, wa_ref, wb_ref, bp_ref,
                       w0, b0, w1, b1, w2, b2, w3, b3, o_ref, s_ref):
    """skip (2-operand 1x1 + ReLU) fused with the following DenseBlock."""
    c0 = _skip_pre(a_ref, c_ref, wa_ref, wb_ref, bp_ref, s_ref)
    _grow(s_ref, ((w0, b0), (w1, b1), (w2, b2), (w3, b3)), c0)
    o_ref[...] = jnp.maximum(s_ref[...], 0.0).astype(o_ref.dtype)


def _skip_dense_tail_kernel(a_ref, c_ref, wa_ref, wb_ref, bp_ref,
                            w0, b0, w1, b1, w2, b2, w3, b3,
                            wt_ref, bt_ref, o_ref, s_ref, *, tail):
    """skip + DenseBlock + trailing op (per-decoder, decoder = grid axis).

    tail == "relu_mm": ConvTranspose1d(k=2,s=2) as a matmul + ReLU  (TU1).
    tail == "rowsum":  1x1 conv down to a single channel           (final).
    """
    c0 = _skip_pre(a_ref, c_ref, wa_ref, wb_ref, bp_ref, s_ref)
    _grow(s_ref, ((w0, b0), (w1, b1), (w2, b2), (w3, b3)), c0)
    h = jnp.maximum(s_ref[...], 0.0)
    if tail == "relu_mm":
        y = jnp.dot(h.astype(jnp.bfloat16), wt_ref[...],
                    preferred_element_type=jnp.float32) + bt_ref[...]
        y = jnp.maximum(y, 0.0)
    else:  # "rowsum": wt_ref is a (1, K) f32 row vector
        y = jnp.sum(h.astype(jnp.float32) * wt_ref[...],
                    axis=-1, keepdims=True) + bt_ref[...]
    o_ref[...] = y.astype(o_ref.dtype)


def _mm_kernel(x_ref, w_ref, b_ref, o_ref, *, relu):
    acc = jnp.dot(x_ref[...], w_ref[...],
                  preferred_element_type=jnp.float32) + b_ref[...]
    if relu:
        acc = jnp.maximum(acc, 0.0)
    o_ref[...] = acc.astype(o_ref.dtype)


# --------------------------------------------------------------------------
# BlockSpec helpers
# --------------------------------------------------------------------------
def _whole(arr):
    nd = arr.ndim
    return pl.BlockSpec(tuple(arr.shape), lambda *_: (0,) * nd)


def _dec_whole(arr):
    """Per-decoder weight: leading (ND) dim indexed by the decoder grid axis."""
    rest = tuple(arr.shape[1:])
    nr = len(rest)
    return pl.BlockSpec((None,) + rest, lambda b, d: (d,) + (0,) * nr)


def _growth_args_specs(growth, spec_fn):
    args, specs = [], []
    for gp in growth:
        args += [gp["w"], gp["b"]]
        specs += [spec_fn(gp["w"]), spec_fn(gp["b"])]
    return args, specs


def _grown_width(p, c0):
    return c0 + sum(int(gp["w"].shape[-1]) for gp in p["growth"])


# --------------------------------------------------------------------------
# Kernel wrappers
# --------------------------------------------------------------------------
def enc_head_fwd(p, x):
    """first_conv + DenseBD1;  x: (B, L, Cin) bf16 -> (B, L, 144)."""
    B, L, Cin = x.shape
    c0 = int(p["wpre"].shape[-1])
    cout = _grown_width(p, c0)
    gargs, gspecs = _growth_args_specs(p["growth"], _whole)
    return pl.pallas_call(
        _enc_head_kernel,
        out_shape=jax.ShapeDtypeStruct((B, L, cout), jnp.bfloat16),
        grid_spec=pltpu.PrefetchScalarGridSpec(
            num_scalar_prefetch=0, grid=(B,),
            in_specs=[pl.BlockSpec((None, L, Cin), lambda b: (b, 0, 0)),
                      _whole(p["wpre"]), _whole(p["bpre"])] + gspecs,
            out_specs=pl.BlockSpec((None, L, cout), lambda b: (b, 0, 0)),
            scratch_shapes=[pltpu.VMEM((L, cout), jnp.bfloat16)]),
        compiler_params=_cp(1),
    )(x, p["wpre"], p["bpre"], *gargs)


def dense_block_fwd(p, x):
    """DenseBlock: (B, L, C) -> (B, L, C+96)."""
    B, L, C = x.shape
    cout = _grown_width(p, C)
    gargs, gspecs = _growth_args_specs(p["growth"], _whole)
    return pl.pallas_call(
        _dense_block_kernel,
        out_shape=jax.ShapeDtypeStruct((B, L, cout), jnp.bfloat16),
        grid_spec=pltpu.PrefetchScalarGridSpec(
            num_scalar_prefetch=0, grid=(B,),
            in_specs=[pl.BlockSpec((None, L, C), lambda b: (b, 0, 0))] + gspecs,
            out_specs=pl.BlockSpec((None, L, cout), lambda b: (b, 0, 0)),
            scratch_shapes=[pltpu.VMEM((L, cout), jnp.bfloat16)]),
        compiler_params=_cp(1),
    )(x, *gargs)


def skip_dense_fwd(p, xa, xb):
    """skip(xa, xb) fused with the following DenseBlock (skip4+BU4, skip3+BU3)."""
    B, L, Ca = xa.shape
    Cb = xb.shape[-1]
    c0 = int(p["bpre"].shape[-1])
    cout = _grown_width(p, c0)
    gargs, gspecs = _growth_args_specs(p["growth"], _whole)
    return pl.pallas_call(
        _skip_dense_kernel,
        out_shape=jax.ShapeDtypeStruct((B, L, cout), jnp.bfloat16),
        grid_spec=pltpu.PrefetchScalarGridSpec(
            num_scalar_prefetch=0, grid=(B,),
            in_specs=[pl.BlockSpec((None, L, Ca), lambda b: (b, 0, 0)),
                      pl.BlockSpec((None, L, Cb), lambda b: (b, 0, 0)),
                      _whole(p["wa"]), _whole(p["wb"]), _whole(p["bpre"])]
                     + gspecs,
            out_specs=pl.BlockSpec((None, L, cout), lambda b: (b, 0, 0)),
            scratch_shapes=[pltpu.VMEM((L, cout), jnp.bfloat16)]),
        compiler_params=_cp(1),
    )(xa, xb, p["wa"], p["wb"], p["bpre"], *gargs)


def decoder_head_fwd(p, x17, x4):
    """All 16 decoders: skip2 + DenseBD2 + TU1, decoder index = grid axis.

    Returns (ND, B, 2*L2, 92) — TU1's stride-2 upsampled, ReLU'd output.
    """
    B, L2, C17 = x17.shape
    C4 = x4.shape[-1]
    nd = int(p["wa"].shape[0])
    c0 = int(p["bpre"].shape[-1])
    cmid = _grown_width(p, c0)
    nt = int(p["wt"].shape[-1])
    gargs, gspecs = _growth_args_specs(p["growth"], _dec_whole)
    out = pl.pallas_call(
        functools.partial(_skip_dense_tail_kernel, tail="relu_mm"),
        out_shape=jax.ShapeDtypeStruct((nd, B, L2, nt), jnp.bfloat16),
        grid_spec=pltpu.PrefetchScalarGridSpec(
            num_scalar_prefetch=0, grid=(B, nd),   # d innermost: x17/x4 not re-DMA'd
            in_specs=[pl.BlockSpec((None, L2, C17), lambda b, d: (b, 0, 0)),
                      pl.BlockSpec((None, L2, C4), lambda b, d: (b, 0, 0)),
                      _dec_whole(p["wa"]), _dec_whole(p["wb"]),
                      _dec_whole(p["bpre"])] + gspecs
                     + [_dec_whole(p["wt"]), _dec_whole(p["bt"])],
            out_specs=pl.BlockSpec((None, None, L2, nt),
                                   lambda b, d: (d, b, 0, 0)),
            scratch_shapes=[pltpu.VMEM((L2, cmid), jnp.bfloat16)]),
        compiler_params=_cp(2),
    )(x17, x4, p["wa"], p["wb"], p["bpre"], *gargs, p["wt"], p["bt"])
    # ConvTranspose columns are tap-major: (.., L2, 2*92) -> (.., 2*L2, 92)
    return out.reshape(nd, B, 2 * L2, nt // 2)


def decoder_tail_fwd(p, t, x2):
    """All 16 decoders: skip1 + DenseBD1 + final 1x1 -> (ND, B, L, 1) f32."""
    nd, B, L, Ct = t.shape
    C2 = x2.shape[-1]
    c0 = int(p["bpre"].shape[-1])
    cmid = _grown_width(p, c0)
    gargs, gspecs = _growth_args_specs(p["growth"], _dec_whole)
    return pl.pallas_call(
        functools.partial(_skip_dense_tail_kernel, tail="rowsum"),
        out_shape=jax.ShapeDtypeStruct((nd, B, L, 1), jnp.float32),
        grid_spec=pltpu.PrefetchScalarGridSpec(
            num_scalar_prefetch=0, grid=(B, nd),   # d innermost: x2 not re-DMA'd
            in_specs=[pl.BlockSpec((None, None, L, Ct),
                                   lambda b, d: (d, b, 0, 0)),
                      pl.BlockSpec((None, L, C2), lambda b, d: (b, 0, 0)),
                      _dec_whole(p["wa"]), _dec_whole(p["wb"]),
                      _dec_whole(p["bpre"])] + gspecs
                     + [_dec_whole(p["wf"]), _dec_whole(p["bf"])],
            out_specs=pl.BlockSpec((None, None, L, 1),
                                   lambda b, d: (d, b, 0, 0)),
            scratch_shapes=[pltpu.VMEM((L, cmid), jnp.bfloat16)]),
        compiler_params=_cp(2),
    )(t, x2, p["wa"], p["wb"], p["bpre"], *gargs, p["wf"], p["bf"])


def matmul_bias_act(x, p, relu, out_dtype=jnp.bfloat16):
    """y = act(x @ W + b); x: (..., K) -> (..., N). K kept at true extent."""
    lead = x.shape[:-1]
    K = x.shape[-1]
    w, b = p["w"], p["b"]
    N = int(w.shape[-1])
    x2 = x.reshape(-1, K)
    if x2.dtype != jnp.bfloat16:
        x2 = x2.astype(jnp.bfloat16)
    M = x2.shape[0]
    TM = M if M <= MAX_TM else MAX_TM
    TN = N if N <= MAX_TN_FULL else TN_TILE
    grid = (pl.cdiv(N, TN), pl.cdiv(M, TM))      # M innermost: weight block reused
    out = pl.pallas_call(
        functools.partial(_mm_kernel, relu=relu),
        out_shape=jax.ShapeDtypeStruct((M, N), out_dtype),
        grid_spec=pltpu.PrefetchScalarGridSpec(
            num_scalar_prefetch=0, grid=grid,
            in_specs=[pl.BlockSpec((TM, K), lambda j, i: (i, 0)),
                      pl.BlockSpec((K, TN), lambda j, i: (0, j)),
                      pl.BlockSpec((1, TN), lambda j, i: (0, j))],
            out_specs=pl.BlockSpec((TM, TN), lambda j, i: (i, j))),
        compiler_params=_cp(2),
    )(x2, w, b)
    return out.reshape(lead + (N,))


def td_fwd(p, x):                      # Conv1d(k=2, stride=2), no activation
    B, L, C = x.shape
    return matmul_bias_act(x.reshape(B, L // 2, 2 * C), p, relu=False)


def tu_fwd(p, x):                      # ConvTranspose1d(k=2, stride=2) + ReLU
    B, L, _ = x.shape
    two_cout = int(p["w"].shape[-1])
    y = matmul_bias_act(x, p, relu=True)
    return y.reshape(B, 2 * L, two_cout // 2)


# --------------------------------------------------------------------------
# Full forward
# --------------------------------------------------------------------------
def dfcn_forward(prep, x_ncl):
    x_nlc = jnp.transpose(x_ncl, (0, 2, 1))             # NCL -> NLC (f32)
    xb = x_nlc.astype(jnp.bfloat16)
    x2 = enc_head_fwd(prep["enc_head"], xb)              # (B, L, 144)
    x3 = td_fwd(prep["TD1"], x2)                         # (B, L/2, 144)
    x4 = dense_block_fwd(prep["DenseBD2"], x3)           # (B, L/2, 240)
    x5 = td_fwd(prep["TD2"], x4)
    x6 = dense_block_fwd(prep["DenseBD3"], x5)           # (B, L/4, 336)
    x7 = td_fwd(prep["TD3"], x6)
    x8 = dense_block_fwd(prep["DenseBD4"], x7)           # (B, L/8, 432)
    x9 = td_fwd(prep["TD4"], x8)
    x10 = dense_block_fwd(prep["bottleneck"], x9)        # (B, L/16, 528)
    x11 = tu_fwd(prep["TU4"], x10)                       # (B, L/8, 264)
    x13 = skip_dense_fwd(prep["skipBU4"], x11, x8)       # (B, L/8, 270)
    x14 = tu_fwd(prep["TU3"], x13)                       # (B, L/4, 135)
    x16 = skip_dense_fwd(prep["skipBU3"], x14, x6)       # (B, L/4, 214)
    x17 = tu_fwd(prep["TU2"], x16)                       # (B, L/2, 107)
    t92 = decoder_head_fwd(prep["dec_head"], x17, x4)    # (ND, B, L, 92)
    y = decoder_tail_fwd(prep["dec_tail"], t92, x2)      # (ND, B, L, 1) f32
    x18 = jnp.transpose(y[..., 0], (1, 0, 2))            # (B, ND, L)
    return x18 + x_ncl.astype(jnp.float32)               # residual, NCL out


# --------------------------------------------------------------------------
# One-time parameter preparation (all transposes/splits hoisted out of forward)
# --------------------------------------------------------------------------
def _npf(a):
    return np.asarray(a, np.float32)


def _conv3_np(p):                      # (Cout, Cin, 3) -> (3, Cin, Cout), (1, Cout)
    return np.transpose(_npf(p["w"]), (2, 1, 0)), _npf(p["b"]).reshape(1, -1)


def _skip_np(p, ca):                   # 1x1 conv split at the concat boundary
    w = _npf(p["w"])[:, :, 0].T        # (Cin, Cout)
    return w[:ca], w[ca:], _npf(p["b"]).reshape(1, -1)


def _convT_np(p):                      # (Cin, Cout, 2) -> (Cin, 2*Cout) tap-major
    w = _npf(p["w"])
    cin, cout, _ = w.shape
    return (np.transpose(w, (0, 2, 1)).reshape(cin, 2 * cout),
            np.tile(_npf(p["b"]), 2).reshape(1, -1))


def _bf(a):
    return jnp.asarray(a, jnp.bfloat16)


def _f32(a):
    return jnp.asarray(a, jnp.float32)


def prep_growth(plist):
    out = []
    for p in plist:
        w, b = _conv3_np(p)
        out.append({"w": _bf(w), "b": _f32(b)})
    return out


def prep_growth_dec(decs, name):
    out = []
    for i in range(4):
        ws = np.stack([_conv3_np(d[name][i])[0] for d in decs])
        bs = np.stack([_conv3_np(d[name][i])[1] for d in decs])
        out.append({"w": _bf(ws), "b": _f32(bs)})
    return out


def prep_td(p):
    w = _npf(p["w"])                   # (C, C, 2)
    cout, cin, _ = w.shape
    return {"w": _bf(np.transpose(w, (2, 1, 0)).reshape(2 * cin, cout)),
            "b": _f32(_npf(p["b"]).reshape(1, -1))}


def prep_tu(p):
    w, b = _convT_np(p)
    return {"w": _bf(w), "b": _f32(b)}


def prep_skip_dense(skip_p, db_list, ca):
    wa, wb, b = _skip_np(skip_p, ca)
    return {"wa": _bf(wa), "wb": _bf(wb), "bpre": _f32(b),
            "growth": prep_growth(db_list)}


def prep_enc_head(first_conv, db1):
    w, b = _conv3_np(first_conv)
    return {"wpre": _bf(w), "bpre": _f32(b), "growth": prep_growth(db1)}


def prep_decoder_head(decs):
    wa = np.stack([_skip_np(d["skip2"], 107)[0] for d in decs])
    wb = np.stack([_skip_np(d["skip2"], 107)[1] for d in decs])
    bp = np.stack([_skip_np(d["skip2"], 107)[2] for d in decs])
    wt = np.stack([_convT_np(d["TU1"])[0] for d in decs])
    bt = np.stack([_convT_np(d["TU1"])[1] for d in decs])
    return {"wa": _bf(wa), "wb": _bf(wb), "bpre": _f32(bp),
            "growth": prep_growth_dec(decs, "DenseBD2"),
            "wt": _bf(wt), "bt": _f32(bt)}


def prep_decoder_tail(decs):
    wa = np.stack([_skip_np(d["skip1"], 92)[0] for d in decs])
    wb = np.stack([_skip_np(d["skip1"], 92)[1] for d in decs])
    bp = np.stack([_skip_np(d["skip1"], 92)[2] for d in decs])
    wf = np.stack([_npf(d["final"]["w"])[:, :, 0] for d in decs])       # (ND,1,155)
    bf = np.stack([_npf(d["final"]["b"]).reshape(1, 1) for d in decs])  # (ND,1,1)
    return {"wa": _bf(wa), "wb": _bf(wb), "bpre": _f32(bp),
            "growth": prep_growth_dec(decs, "DenseBD1"),
            "wf": _f32(wf), "bf": _f32(bf)}


def prepare_params(params):
    return {
        "enc_head": prep_enc_head(params["first_conv"], params["DenseBD1"]),
        "DenseBD2": {"growth": prep_growth(params["DenseBD2"])},
        "DenseBD3": {"growth": prep_growth(params["DenseBD3"])},
        "DenseBD4": {"growth": prep_growth(params["DenseBD4"])},
        "bottleneck": {"growth": prep_growth(params["bottleneck"])},
        "TD1": prep_td(params["TD1"]),
        "TD2": prep_td(params["TD2"]),
        "TD3": prep_td(params["TD3"]),
        "TD4": prep_td(params["TD4"]),
        "TU4": prep_tu(params["TU4"]),
        "TU3": prep_tu(params["TU3"]),
        "TU2": prep_tu(params["TU2"]),
        "skipBU4": prep_skip_dense(params["skip4"], params["DenseBU4"], 264),
        "skipBU3": prep_skip_dense(params["skip3"], params["DenseBU3"], 135),
        "dec_head": prep_decoder_head(params["decoders"]),
        "dec_tail": prep_decoder_tail(params["decoders"]),
    }


# --------------------------------------------------------------------------
# Deterministic parameter init (PyTorch layouts, PyTorch-like uniform bounds)
# --------------------------------------------------------------------------
def _conv_init(key, cout, cin, ksize):
    k1, k2 = jax.random.split(key)
    bound = 1.0 / (cin * ksize) ** 0.5
    return {"w": jax.random.uniform(k1, (cout, cin, ksize), jnp.float32,
                                    -bound, bound),
            "b": jax.random.uniform(k2, (cout,), jnp.float32, -bound, bound)}


def _convT_init(key, cin, cout, ksize):
    k1, k2 = jax.random.split(key)
    bound = 1.0 / (cin * ksize) ** 0.5
    return {"w": jax.random.uniform(k1, (cin, cout, ksize), jnp.float32,
                                    -bound, bound),
            "b": jax.random.uniform(k2, (cout,), jnp.float32, -bound, bound)}


def _dense_block_init(key, in_channel, k=24, num_module=4):
    keys = jax.random.split(key, num_module)
    return [_conv_init(keys[i], k, in_channel + k * i, 3)
            for i in range(num_module)]


def _decoder1_init(key):
    ks = jax.random.split(key, 6)
    return {"skip2": _conv_init(ks[0], 87, 347, 1),
            "DenseBD2": _dense_block_init(ks[1], 87),
            "TU1": _convT_init(ks[2], 183, 92, 2),
            "skip1": _conv_init(ks[3], 59, 236, 1),
            "DenseBD1": _dense_block_init(ks[4], 59),
            "final": _conv_init(ks[5], 1, 155, 1)}


def dfcn_init(key, in_channel=16, num_decoder=ND):
    ks = jax.random.split(key, 18)
    return {
        "first_conv": _conv_init(ks[0], 48, in_channel, 3),
        "DenseBD1": _dense_block_init(ks[1], 48),
        "DenseBD2": _dense_block_init(ks[2], 144),
        "DenseBD3": _dense_block_init(ks[3], 240),
        "DenseBD4": _dense_block_init(ks[4], 336),
        "TD1": _conv_init(ks[5], 144, 144, 2),
        "TD2": _conv_init(ks[6], 240, 240, 2),
        "TD3": _conv_init(ks[7], 336, 336, 2),
        "TD4": _conv_init(ks[8], 432, 432, 2),
        "bottleneck": _dense_block_init(ks[9], 432),
        "TU4": _convT_init(ks[10], 528, 264, 2),
        "TU3": _convT_init(ks[11], 270, 135, 2),
        "TU2": _convT_init(ks[12], 214, 107, 2),
        "skip4": _conv_init(ks[13], 174, 696, 1),
        "skip3": _conv_init(ks[14], 118, 471, 1),
        "DenseBU4": _dense_block_init(ks[15], 174),
        "DenseBU3": _dense_block_init(ks[16], 118),
        "decoders": [_decoder1_init(k)
                     for k in jax.random.split(ks[17], num_decoder)],
    }


# --------------------------------------------------------------------------
# Plain-JAX reference for the fused DenseBlock (self-check of conv logic)
# --------------------------------------------------------------------------
def _dense_block_reference(p, x):
    h = x.astype(jnp.float32)
    L = h.shape[1]
    for gp in p["growth"]:
        w = gp["w"].astype(jnp.float32)           # (3, K, 24)
        b = gp["b"].astype(jnp.float32)
        hp = jnp.pad(h, ((0, 0), (1, 1), (0, 0)))
        y = sum(jnp.einsum("blk,kn->bln", hp[:, t:t + L, :], w[t])
                for t in range(3)) + b
        h = jnp.concatenate([h, y], axis=-1)
    return jnp.maximum(h, 0.0)


if __name__ == "__main__":
    key = jax.random.PRNGKey(0)
    pkey, xkey = jax.random.split(key)
    params = dfcn_init(pkey)
    prep = prepare_params(params)      # one-time transpose / split / bf16 cast

    # Input (N, C, L): L must be divisible by 16 (four /2 downsamplings).
    B, C, L = 2, 16, 16
    x = jax.random.normal(xkey, (B, C, L), jnp.float32)

    # Self-check: fused dense-block kernel vs a plain-JAX reference.
    xt = jax.random.normal(jax.random.PRNGKey(1), (2, 8, 144),
                           jnp.float32).astype(jnp.bfloat16)
    got = dense_block_fwd(prep["DenseBD2"], xt).astype(jnp.float32)
    ref = _dense_block_reference(prep["DenseBD2"], xt)
    err = float(jnp.max(jnp.abs(got - ref)))
    assert err < 0.1, f"dense block mismatch: max abs err {err}"

    fwd = jax.jit(dfcn_forward)
    out = jax.block_until_ready(fwd(prep, x))
    assert out.shape == (B, 16, L), out.shape
    assert bool(jnp.all(jnp.isfinite(out)))
    print("KERNEL_OK")
</pallas_src>

<mosaic_0001>
module attributes {stable_mosaic.version = 11 : i64} {
  func.func @_dense_block_kernel(%arg0: i32, %arg1: memref<1x8x144xbf16, #tpu.memory_space<vmem>>, %arg2: memref<3x144x24xbf16, #tpu.memory_space<vmem>>, %arg3: memref<1x24xf32, #tpu.memory_space<vmem>>, %arg4: memref<3x168x24xbf16, #tpu.memory_space<vmem>>, %arg5: memref<1x24xf32, #tpu.memory_space<vmem>>, %arg6: memref<3x192x24xbf16, #tpu.memory_space<vmem>>, %arg7: memref<1x24xf32, #tpu.memory_space<vmem>>, %arg8: memref<3x216x24xbf16, #tpu.memory_space<vmem>>, %arg9: memref<1x24xf32, #tpu.memory_space<vmem>>, %arg10: memref<1x8x240xbf16, #tpu.memory_space<vmem>>, %arg11: memref<8x240xbf16, #tpu.memory_space<vmem>>) attributes {dimension_semantics = [#tpu.dimension_semantics<parallel>], iteration_bounds = array<i64: 2>, scalar_prefetch = 0 : i64, scratch_operands = 1 : i64, tpu.core_type = #tpu.core_type<tc>, window_params = [{transform_indices = @transform_0, window_bounds = array<i64: 1, 8, 144>}, {pipeline_mode = #tpu.pipeline_mode<synchronous>, transform_indices = @transform_1, window_bounds = array<i64: 3, 144, 24>}, {pipeline_mode = #tpu.pipeline_mode<synchronous>, transform_indices = @transform_2, window_bounds = array<i64: 1, 24>}, {pipeline_mode = #tpu.pipeline_mode<synchronous>, transform_indices = @transform_3, window_bounds = array<i64: 3, 168, 24>}, {pipeline_mode = #tpu.pipeline_mode<synchronous>, transform_indices = @transform_4, window_bounds = array<i64: 1, 24>}, {pipeline_mode = #tpu.pipeline_mode<synchronous>, transform_indices = @transform_5, window_bounds = array<i64: 3, 192, 24>}, {pipeline_mode = #tpu.pipeline_mode<synchronous>, transform_indices = @transform_6, window_bounds = array<i64: 1, 24>}, {pipeline_mode = #tpu.pipeline_mode<synchronous>, transform_indices = @transform_7, window_bounds = array<i64: 3, 216, 24>}, {pipeline_mode = #tpu.pipeline_mode<synchronous>, transform_indices = @transform_8, window_bounds = array<i64: 1, 24>}, {transform_indices = @transform_9, window_bounds = array<i64: 1, 8, 240>}]} {
    %c0 = arith.constant 0 : index
    %c0_0 = arith.constant 0 : index
    %c0_1 = arith.constant 0 : index
    %0 = vector.load %arg1[%c0, %c0_0, %c0_1] : memref<1x8x144xbf16, #tpu.memory_space<vmem>>, vector<1x8x144xbf16>
    %1 = vector.shape_cast %0 : vector<1x8x144xbf16> to vector<8x144xbf16>
    %c0_2 = arith.constant 0 : index
    %c0_3 = arith.constant 0 : index
    %2 = vector.load %arg11[%c0_2, %c0_3] : memref<8x240xbf16, #tpu.memory_space<vmem>>, vector<8x144xbf16>
    tpu.vector_store %arg11[%c0_2, %c0_3], %1 {strides = array<i32>} : memref<8x240xbf16, #tpu.memory_space<vmem>>, vector<8x144xbf16>,
    %c0_4 = arith.constant 0 : index
    %c0_5 = arith.constant 0 : index
    %3 = vector.load %arg11[%c0_4, %c0_5] : memref<8x240xbf16, #tpu.memory_space<vmem>>, vector<8x144xbf16>
    %c0_6 = arith.constant 0 : index
    %c0_7 = arith.constant 0 : index
    %c0_8 = arith.constant 0 : index
    %4 = vector.load %arg2[%c0_6, %c0_7, %c0_8] : memref<3x144x24xbf16, #tpu.memory_space<vmem>>, vector<1x144x24xbf16>
    %5 = vector.shape_cast %4 : vector<1x144x24xbf16> to vector<144x24xbf16>
    %cst = arith.constant dense<0.000000e+00> : vector<8x24xf32>
    %6 = tpu.matmul %3, %5, %cst {dimension_numbers = #tpu.dot_dimension_numbers<[1], [0], [0], [1], [0, 0, 1, 1], [], []>} : vector<8x144xbf16>, vector<144x24xbf16>, vector<8x24xf32> -> vector<8x24xf32>
    %c1 = arith.constant 1 : index
    %c0_9 = arith.constant 0 : index
    %c0_10 = arith.constant 0 : index
    %7 = vector.load %arg2[%c1, %c0_9, %c0_10] : memref<3x144x24xbf16, #tpu.memory_space<vmem>>, vector<1x144x24xbf16>
    %8 = vector.shape_cast %7 : vector<1x144x24xbf16> to vector<144x24xbf16>
    %cst_11 = arith.constant dense<0.000000e+00> : vector<8x24xf32>
    %9 = tpu.matmul %3, %8, %cst_11 {dimension_numbers = #tpu.dot_dimension_numbers<[1], [0], [0], [1], [0, 0, 1, 1], [], []>} : vector<8x144xbf16>, vector<144x24xbf16>, vector<8x24xf32> -> vector<8x24xf32>
    %c2 = arith.constant 2 : index
    %c0_12 = arith.constant 0 : index
    %c0_13 = arith.constant 0 : index
    %10 = vector.load %arg2[%c2, %c0_12, %c0_13] : memref<3x144x24xbf16, #tpu.memory_space<vmem>>, vector<1x144x24xbf16>
    %11 = vector.shape_cast %10 : vector<1x144x24xbf16> to vector<144x24xbf16>
    %cst_14 = arith.constant dense<0.000000e+00> : vector<8x24xf32>
    %12 = tpu.matmul %3, %11, %cst_14 {dimension_numbers = #tpu.dot_dimension_numbers<[1], [0], [0], [1], [0, 0, 1, 1], [], []>} : vector<8x144xbf16>, vector<144x24xbf16>, vector<8x24xf32> -> vector<8x24xf32>
    %cst_15 = arith.constant 0.000000e+00 : f32
    %13 = vector.broadcast %cst_15 : f32 to vector<1x24xf32>
    %14 = vector.extract_strided_slice %6 {offsets = [0, 0], sizes = [7, 24], strides = [1, 1]} : vector<8x24xf32> to vector<7x24xf32>
    %15 = tpu.concatenate %13, %14 in 0 : vector<1x24xf32>, vector<7x24xf32> -> vector<8x24xf32>
    %16 = arith.addf %9, %15 : vector<8x24xf32>
    %cst_16 = arith.constant 0.000000e+00 : f32
    %17 = vector.broadcast %cst_16 : f32 to vector<1x24xf32>
    %18 = vector.extract_strided_slice %12 {offsets = [1, 0], sizes = [7, 24], strides = [1, 1]} : vector<8x24xf32> to vector<7x24xf32>
    %19 = tpu.concatenate %18, %17 in 0 : vector<7x24xf32>, vector<1x24xf32> -> vector<8x24xf32>
    %20 = arith.addf %16, %19 : vector<8x24xf32>
    %c0_17 = arith.constant 0 : index
    %c0_18 = arith.constant 0 : index
    %21 = vector.load %arg3[%c0_17, %c0_18] : memref<1x24xf32, #tpu.memory_space<vmem>>, vector<1x24xf32>
    %22 = vector.broadcast %21 : vector<1x24xf32> to vector<8x24xf32>
    %23 = arith.addf %20, %22 : vector<8x24xf32>
    %24 = arith.truncf %23 : vector<8x24xf32> to vector<8x24xbf16>
    %c0_19 = arith.constant 0 : index
    %c144 = arith.constant 144 : index
    %25 = vector.load %arg11[%c0_19, %c144] : memref<8x240xbf16, #tpu.memory_space<vmem>>, vector<8x24xbf16>
    tpu.vector_store %arg11[%c0_19, %c144], %24 {strides = array<i32>} : memref<8x240xbf16, #tpu.memory_space<vmem>>, vector<8x24xbf16>,
    %c0_20 = arith.constant 0 : index
    %c0_21 = arith.constant 0 : index
    %26 = vector.load %arg11[%c0_20, %c0_21] : memref<8x240xbf16, #tpu.memory_space<vmem>>, vector<8x168xbf16>
    %c0_22 = arith.constant 0 : index
    %c0_23 = arith.constant 0 : index
    %c0_24 = arith.constant 0 : index
    %27 = vector.load %arg4[%c0_22, %c0_23, %c0_24] : memref<3x168x24xbf16, #tpu.memory_space<vmem>>, vector<1x168x24xbf16>
    %28 = vector.shape_cast %27 : vector<1x168x24xbf16> to vector<168x24xbf16>
    %cst_25 = arith.constant dense<0.000000e+00> : vector<8x24xf32>
    %29 = tpu.matmul %26, %28, %cst_25 {dimension_numbers = #tpu.dot_dimension_numbers<[1], [0], [0], [1], [0, 0, 1, 1], [], []>} : vector<8x168xbf16>, vector<168x24xbf16>, vector<8x24xf32> -> vector<8x24xf32>
    %c1_26 = arith.constant 1 : index
    %c0_27 = arith.constant 0 : index
    %c0_28 = arith.constant 0 : index
    %30 = vector.load %arg4[%c1_26, %c0_27, %c0_28] : memref<3x168x24xbf16, #tpu.memory_space<vmem>>, vector<1x168x24xbf16>
    %31 = vector.shape_cast %30 : vector<1x168x24xbf16> to vector<168x24xbf16>
    %cst_29 = arith.constant dense<0.000000e+00> : vector<8x24xf32>
    %32 = tpu.matmul %26, %31, %cst_29 {dimension_numbers = #tpu.dot_dimension_numbers<[1], [0], [0], [1], [0, 0, 1, 1], [], []>} : vector<8x168xbf16>, vector<168x24xbf16>, vector<8x24xf32> -> vector<8x24xf32>
    %c2_30 = arith.constant 2 : index
    %c0_31 = arith.constant 0 : index
    %c0_32 = arith.constant 0 : index
    %33 = vector.load %arg4[%c2_30, %c0_31, %c0_32] : memref<3x168x24xbf16, #tpu.memory_space<vmem>>, vector<1x168x24xbf16>
    %34 = vector.shape_cast %33 : vector<1x168x24xbf16> to vector<168x24xbf16>
    %cst_33 = arith.constant dense<0.000000e+00> : vector<8x24xf32>
    %35 = tpu.matmul %26, %34, %cst_33 {dimension_numbers = #tpu.dot_dimension_numbers<[1], [0], [0], [1], [0, 0, 1, 1], [], []>} : vector<8x168xbf16>, vector<168x24xbf16>, vector<8x24xf32> -> vector<8x24xf32>
    %cst_34 = arith.constant 0.000000e+00 : f32
    %36 = vector.broadcast %cst_34 : f32 to vector<1x24xf32>
    %37 = vector.extract_strided_slice %29 {offsets = [0, 0], sizes = [7, 24], strides = [1, 1]} : vector<8x24xf32> to vector<7x24xf32>
    %38 = tpu.concatenate %36, %37 in 0 : vector<1x24xf32>, vector<7x24xf32> -> vector<8x24xf32>
    %39 = arith.addf %32, %38 : vector<8x24xf32>
    %cst_35 = arith.constant 0.000000e+00 : f32
    %40 = vector.broadcast %cst_35 : f32 to vector<1x24xf32>
    %41 = vector.extract_strided_slice %35 {offsets = [1, 0], sizes = [7, 24], strides = [1, 1]} : vector<8x24xf32> to vector<7x24xf32>
    %42 = tpu.concatenate %41, %40 in 0 : vector<7x24xf32>, vector<1x24xf32> -> vector<8x24xf32>
    %43 = arith.addf %39, %42 : vector<8x24xf32>
    %c0_36 = arith.constant 0 : index
    %c0_37 = arith.constant 0 : index
    %44 = vector.load %arg5[%c0_36, %c0_37] : memref<1x24xf32, #tpu.memory_space<vmem>>, vector<1x24xf32>
    %45 = vector.broadcast %44 : vector<1x24xf32> to vector<8x24xf32>
    %46 = arith.addf %43, %45 : vector<8x24xf32>
    %47 = arith.truncf %46 : vector<8x24xf32> to vector<8x24xbf16>
    %c0_38 = arith.constant 0 : index
    %c168 = arith.constant 168 : index
    %48 = vector.load %arg11[%c0_38, %c168] : memref<8x240xbf16, #tpu.memory_space<vmem>>, vector<8x24xbf16>
    tpu.vector_store %arg11[%c0_38, %c168], %47 {strides = array<i32>} : memref<8x240xbf16, #tpu.memory_space<vmem>>, vector<8x24xbf16>,
    %c0_39 = arith.constant 0 : index
    %c0_40 = arith.constant 0 : index
    %49 = vector.load %arg11[%c0_39, %c0_40] : memref<8x240xbf16, #tpu.memory_space<vmem>>, vector<8x192xbf16>
    %c0_41 = arith.constant 0 : index
    %c0_42 = arith.constant 0 : index
    %c0_43 = arith.constant 0 : index
    %50 = vector.load %arg6[%c0_41, %c0_42, %c0_43] : memref<3x192x24xbf16, #tpu.memory_space<vmem>>, vector<1x192x24xbf16>
    %51 = vector.shape_cast %50 : vector<1x192x24xbf16> to vector<192x24xbf16>
    %cst_44 = arith.constant dense<0.000000e+00> : vector<8x24xf32>
    %52 = tpu.matmul %49, %51, %cst_44 {dimension_numbers = #tpu.dot_dimension_numbers<[1], [0], [0], [1], [0, 0, 1, 1], [], []>} : vector<8x192xbf16>, vector<192x24xbf16>, vector<8x24xf32> -> vector<8x24xf32>
    %c1_45 = arith.constant 1 : index
    %c0_46 = arith.constant 0 : index
    %c0_47 = arith.constant 0 : index
    %53 = vector.load %arg6[%c1_45, %c0_46, %c0_47] : memref<3x192x24xbf16, #tpu.memory_space<vmem>>, vector<1x192x24xbf16>
    %54 = vector.shape_cast %53 : vector<1x192x24xbf16> to vector<192x24xbf16>
    %cst_48 = arith.constant dense<0.000000e+00> : vector<8x24xf32>
    %55 = tpu.matmul %49, %54, %cst_48 {dimension_numbers = #tpu.dot_dimension_numbers<[1], [0], [0], [1], [0, 0, 1, 1], [], []>} : vector<8x192xbf16>, vector<192x24xbf16>, vector<8x24xf32> -> vector<8x24xf32>
    %c2_49 = arith.constant 2 : index
    %c0_50 = arith.constant 0 : index
    %c0_51 = arith.constant 0 : index
    %56 = vector.load %arg6[%c2_49, %c0_50, %c0_51] : memref<3x192x24xbf16, #tpu.memory_space<vmem>>, vector<1x192x24xbf16>
    %57 = vector.shape_cast %56 : vector<1x192x24xbf16> to vector<192x24xbf16>
    %cst_52 = arith.constant dense<0.000000e+00> : vector<8x24xf32>
    %58 = tpu.matmul %49, %57, %cst_52 {dimension_numbers = #tpu.dot_dimension_numbers<[1], [0], [0], [1], [0, 0, 1, 1], [], []>} : vector<8x192xbf16>, vector<192x24xbf16>, vector<8x24xf32> -> vector<8x24xf32>
    %cst_53 = arith.constant 0.000000e+00 : f32
    %59 = vector.broadcast %cst_53 : f32 to vector<1x24xf32>
    %60 = vector.extract_strided_slice %52 {offsets = [0, 0], sizes = [7, 24], strides = [1, 1]} : vector<8x24xf32> to vector<7x24xf32>
    %61 = tpu.concatenate %59, %60 in 0 : vector<1x24xf32>, vector<7x24xf32> -> vector<8x24xf32>
    %62 = arith.addf %55, %61 : vector<8x24xf32>
    %cst_54 = arith.constant 0.000000e+00 : f32
    %63 = vector.broadcast %cst_54 : f32 to vector<1x24xf32>
    %64 = vector.extract_strided_slice %58 {offsets = [1, 0], sizes = [7, 24], strides = [1, 1]} : vector<8x24xf32> to vector<7x24xf32>
    %65 = tpu.concatenate %64, %63 in 0 : vector<7x24xf32>, vector<1x24xf32> -> vector<8x24xf32>
    %66 = arith.addf %62, %65 : vector<8x24xf32>
    %c0_55 = arith.constant 0 : index
    %c0_56 = arith.constant 0 : index
    %67 = vector.load %arg7[%c0_55, %c0_56] : memref<1x24xf32, #tpu.memory_space<vmem>>, vector<1x24xf32>
    %68 = vector.broadcast %67 : vector<1x24xf32> to vector<8x24xf32>
    %69 = arith.addf %66, %68 : vector<8x24xf32>
    %70 = arith.truncf %69 : vector<8x24xf32> to vector<8x24xbf16>
    %c0_57 = arith.constant 0 : index
    %c192 = arith.constant 192 : index
    %71 = vector.load %arg11[%c0_57, %c192] : memref<8x240xbf16, #tpu.memory_space<vmem>>, vector<8x24xbf16>
    tpu.vector_store %arg11[%c0_57, %c192], %70 {strides = array<i32>} : memref<8x240xbf16, #tpu.memory_space<vmem>>, vector<8x24xbf16>,
    %c0_58 = arith.constant 0 : index
    %c0_59 = arith.constant 0 : index
    %72 = vector.load %arg11[%c0_58, %c0_59] : memref<8x240xbf16, #tpu.memory_space<vmem>>, vector<8x216xbf16>
    %c0_60 = arith.constant 0 : index
    %c0_61 = arith.constant 0 : index
    %c0_62 = arith.constant 0 : index
    %73 = vector.load %arg8[%c0_60, %c0_61, %c0_62] : memref<3x216x24xbf16, #tpu.memory_space<vmem>>, vector<1x216x24xbf16>
    %74 = vector.shape_cast %73 : vector<1x216x24xbf16> to vector<216x24xbf16>
    %cst_63 = arith.constant dense<0.000000e+00> : vector<8x24xf32>
    %75 = tpu.matmul %72, %74, %cst_63 {dimension_numbers = #tpu.dot_dimension_numbers<[1], [0], [0], [1], [0, 0, 1, 1], [], []>} : vector<8x216xbf16>, vector<216x24xbf16>, vector<8x24xf32> -> vector<8x24xf32>
    %c1_64 = arith.constant 1 : index
    %c0_65 = arith.constant 0 : index
    %c0_66 = arith.constant 0 : index
    %76 = vector.load %arg8[%c1_64, %c0_65, %c0_66] : memref<3x216x24xbf16, #tpu.memory_space<vmem>>, vector<1x216x24xbf16>
    %77 = vector.shape_cast %76 : vector<1x216x24xbf16> to vector<216x24xbf16>
    %cst_67 = arith.constant dense<0.000000e+00> : vector<8x24xf32>
    %78 = tpu.matmul %72, %77, %cst_67 {dimension_numbers = #tpu.dot_dimension_numbers<[1], [0], [0], [1], [0, 0, 1, 1], [], []>} : vector<8x216xbf16>, vector<216x24xbf16>, vector<8x24xf32> -> vector<8x24xf32>
    %c2_68 = arith.constant 2 : index
    %c0_69 = arith.constant 0 : index
    %c0_70 = arith.constant 0 : index
    %79 = vector.load %arg8[%c2_68, %c0_69, %c0_70] : memref<3x216x24xbf16, #tpu.memory_space<vmem>>, vector<1x216x24xbf16>
    %80 = vector.shape_cast %79 : vector<1x216x24xbf16> to vector<216x24xbf16>
    %cst_71 = arith.constant dense<0.000000e+00> : vector<8x24xf32>
    %81 = tpu.matmul %72, %80, %cst_71 {dimension_numbers = #tpu.dot_dimension_numbers<[1], [0], [0], [1], [0, 0, 1, 1], [], []>} : vector<8x216xbf16>, vector<216x24xbf16>, vector<8x24xf32> -> vector<8x24xf32>
    %cst_72 = arith.constant 0.000000e+00 : f32
    %82 = vector.broadcast %cst_72 : f32 to vector<1x24xf32>
    %83 = vector.extract_strided_slice %75 {offsets = [0, 0], sizes = [7, 24], strides = [1, 1]} : vector<8x24xf32> to vector<7x24xf32>
    %84 = tpu.concatenate %82, %83 in 0 : vector<1x24xf32>, vector<7x24xf32> -> vector<8x24xf32>
    %85 = arith.addf %78, %84 : vector<8x24xf32>
    %cst_73 = arith.constant 0.000000e+00 : f32
    %86 = vector.broadcast %cst_73 : f32 to vector<1x24xf32>
    %87 = vector.extract_strided_slice %81 {offsets = [1, 0], sizes = [7, 24], strides = [1, 1]} : vector<8x24xf32> to vector<7x24xf32>
    %88 = tpu.concatenate %87, %86 in 0 : vector<7x24xf32>, vector<1x24xf32> -> vector<8x24xf32>
    %89 = arith.addf %85, %88 : vector<8x24xf32>
    %c0_74 = arith.constant 0 : index
    %c0_75 = arith.constant 0 : index
    %90 = vector.load %arg9[%c0_74, %c0_75] : memref<1x24xf32, #tpu.memory_space<vmem>>, vector<1x24xf32>
    %91 = vector.broadcast %90 : vector<1x24xf32> to vector<8x24xf32>
    %92 = arith.addf %89, %91 : vector<8x24xf32>
    %93 = arith.truncf %92 : vector<8x24xf32> to vector<8x24xbf16>
    %c0_76 = arith.constant 0 : index
    %c216 = arith.constant 216 : index
    %94 = vector.load %arg11[%c0_76, %c216] : memref<8x240xbf16, #tpu.memory_space<vmem>>, vector<8x24xbf16>
    tpu.vector_store %arg11[%c0_76, %c216], %93 {strides = array<i32>} : memref<8x240xbf16, #tpu.memory_space<vmem>>, vector<8x24xbf16>,
    %c0_77 = arith.constant 0 : index
    %c0_78 = arith.constant 0 : index
    %95 = vector.load %arg11[%c0_77, %c0_78] : memref<8x240xbf16, #tpu.memory_space<vmem>>, vector<8x240xbf16>
    %cst_79 = arith.constant 0.000000e+00 : bf16
    %96 = vector.broadcast %cst_79 : bf16 to vector<8x240xbf16>
    %97 = arith.maximumf %95, %96 : vector<8x240xbf16>
    %c0_80 = arith.constant 0 : index
    %c0_81 = arith.constant 0 : index
    %c0_82 = arith.constant 0 : index
    %98 = vector.load %arg10[%c0_80, %c0_81, %c0_82] : memref<1x8x240xbf16, #tpu.memory_space<vmem>>, vector<1x8x240xbf16>
    %99 = vector.shape_cast %98 : vector<1x8x240xbf16> to vector<8x240xbf16>
    %100 = vector.shape_cast %97 : vector<8x240xbf16> to vector<1x8x240xbf16>
    tpu.vector_store %arg10[%c0_80, %c0_81, %c0_82], %100 {strides = array<i32>} : memref<1x8x240xbf16, #tpu.memory_space<vmem>>, vector<1x8x240xbf16>,
    return
  }
  func.func @transform_0(%arg0: i32) -> (i32, i32, i32) {
    %c0_i32 = arith.constant 0 : i32
    %c0_i32_0 = arith.constant 0 : i32
    %c0_i32_1 = arith.constant 0 : i32
    return %arg0, %c0_i32, %c0_i32_0 : i32, i32, i32
  }
  func.func @transform_1(%arg0: i32) -> (i32, i32, i32) {
    %c0_i32 = arith.constant 0 : i32
    %c0_i32_0 = arith.constant 0 : i32
    %c0_i32_1 = arith.constant 0 : i32
    %c0_i32_2 = arith.constant 0 : i32
    return %c0_i32, %c0_i32_0, %c0_i32_1 : i32, i32, i32
  }
  func.func @transform_2(%arg0: i32) -> (i32, i32) {
    %c0_i32 = arith.constant 0 : i32
    %c0_i32_0 = arith.constant 0 : i32
    %c0_i32_1 = arith.constant 0 : i32
    return %c0_i32, %c0_i32_0 : i32, i32
  }
  func.func @transform_3(%arg0: i32) -> (i32, i32, i32) {
    %c0_i32 = arith.constant 0 : i32
    %c0_i32_0 = arith.constant 0 : i32
    %c0_i32_1 = arith.constant 0 : i32
    %c0_i32_2 = arith.constant 0 : i32
    return %c0_i32, %c0_i32_0, %c0_i32_1 : i32, i32, i32
  }
  func.func @transform_4(%arg0: i32) -> (i32, i32) {
    %c0_i32 = arith.constant 0 : i32
    %c0_i32_0 = arith.constant 0 : i32
    %c0_i32_1 = arith.constant 0 : i32
    return %c0_i32, %c0_i32_0 : i32, i32
  }
  func.func @transform_5(%arg0: i32) -> (i32, i32, i32) {
    %c0_i32 = arith.constant 0 : i32
    %c0_i32_0 = arith.constant 0 : i32
    %c0_i32_1 = arith.constant 0 : i32
    %c0_i32_2 = arith.constant 0 : i32
    return %c0_i32, %c0_i32_0, %c0_i32_1 : i32, i32, i32
  }
  func.func @transform_6(%arg0: i32) -> (i32, i32) {
    %c0_i32 = arith.constant 0 : i32
    %c0_i32_0 = arith.constant 0 : i32
    %c0_i32_1 = arith.constant 0 : i32
    return %c0_i32, %c0_i32_0 : i32, i32
  }
  func.func @transform_7(%arg0: i32) -> (i32, i32, i32) {
    %c0_i32 = arith.constant 0 : i32
    %c0_i32_0 = arith.constant 0 : i32
    %c0_i32_1 = arith.constant 0 : i32
    %c0_i32_2 = arith.constant 0 : i32
    return %c0_i32, %c0_i32_0, %c0_i32_1 : i32, i32, i32
  }
  func.func @transform_8(%arg0: i32) -> (i32, i32) {
    %c0_i32 = arith.constant 0 : i32
    %c0_i32_0 = arith.constant 0 : i32
    %c0_i32_1 = arith.constant 0 : i32
    return %c0_i32, %c0_i32_0 : i32, i32
  }
  func.func @transform_9(%arg0: i32) -> (i32, i32, i32) {
    %c0_i32 = arith.constant 0 : i32
    %c0_i32_0 = arith.constant 0 : i32
    %c0_i32_1 = arith.constant 0 : i32
    return %arg0, %c0_i32, %c0_i32_0 : i32, i32, i32
  }
}

</mosaic_0001>

<bundles_post_ra>
// kernel: tpu_custom_call.1
= control target key start
LH: loop header
LB: loop body
LE: loop exit
PB: predicated region body
PF: predicated region fallthrough
CT: control target
= control target key end

     0   :  { %14 = vsyncpa [#allocation4], 0  ;;  %s3510_s0 = inlined_call_operand.vmem [shape: bf16[2,8,144], index: 0, kind: input, shape index: {}]   ;;  %s3511_s1 = inlined_call_operand.vmem [shape: bf16[3,144,24], index: 1, kind: input, shape index: {}]   ;;  %s3512_s2 = inlined_call_operand.vmem [shape: f32[1,24], index: 2, kind: input, shape index: {}]   ;;  %s3513_s3 = inlined_call_operand.vmem [shape: bf16[3,168,24], index: 3, kind: input, shape index: {}]   ;;  %s3514_s4 = inlined_call_operand.vmem [shape: f32[1,24], index: 4, kind: input, shape index: {}]   ;;  %s3515_s5 = inlined_call_operand.vmem [shape: bf16[3,192,24], index: 5, kind: input, shape index: {}]   ;;  %s3516_s6 = inlined_call_operand.vmem [shape: f32[1,24], index: 6, kind: input, shape index: {}]   ;;  %s3517_s7 = inlined_call_operand.vmem [shape: bf16[3,216,24], index: 7, kind: input, shape index: {}]   ;;  %s3518_s8 = inlined_call_operand.vmem [shape: f32[1,24], index: 8, kind: input, shape index: {}]   ;;  %s3519_s9 = inlined_call_operand.hbm [shape: bf16[2,8,240], index: 9, kind: output, shape index: {}]  }
   0x1   :  { %16 = vsyncpa [#allocation4 + $0x1], 0  ;;  %s2826_s30 = smov 0   ;;  %s2828_s10 = smov 0  }
   0x2   :  { %s2830_s11 = smov 0   ;;  %s2832_s12 = smov 0  }
   0x3 LB: > { %s2847_s13 = sadd.s32 4294967295, %s2768_s12   ;;  %s2152_s14 = sadd.s32 4294967294, %s2768_s12   ;;  %s2768_s12 = sphi %s2832_s12, %s3525_s12   ;;  %s2764_s11 = sphi %s2830_s11, %s3524_s11   ;;  %s2760_s10 = sphi %s2828_s10, %s3523_s10   ;;  %s2756_s30 = sphi %s2826_s30, %s3522_s30  }
   0x4   : > { %s2851_s15 = sadd.s32 1, %s2768_s12   ;;  %s223_s16 = sadd.s32 1, %s2764_s11 }
   0x5   : > { %s220_s17 = ssub.s32 %s2768_s12, %s2851_s15  ;;  %p233_p0 = scmp.ne.s32.totalorder %s2764_s11, %s2760_s10 }
   0x6   : > { %p221_p1 = scmp.eq.s32.totalorder %s220_s17, 0  ;;  %p234_p2 = scmp.eq.s32.totalorder %s2847_s13, 1 }
   0x7   : > { %p239_p3 = scmp.ne.s32.totalorder %s2760_s10, %s2756_s30  ;;  %p240_p4 = scmp.eq.s32.totalorder %s2152_s14, 1 }
   0x8   : > { %s2862_s18 = scalar_select %p221_p1, %s2764_s11, %s223_s16  }
   0x9   : > { %p2864_p5 = por %p234_p2, %p233_p0  ;;  %p2868_p6 = por %p240_p4, %p239_p3 }
   0xa   : > { %p2155_p7 = scmp.ge.s32.totalorder %s2768_s12, 1  ;;  %p290_p8 = scmp.lt.s32.totalorder %s2768_s12, 3 }
   0xc   : > { %p291_p9 = pnand %p2155_p7, %p290_p8 }
   0xd   : > { %v2560_v0 = vld [vmem:[%s3511_s1] sm:$0xff] (!%p291_p9)   ;;  %v2770_v1 = vmov (!%p291_p9), 0   ;;  %p326_p10 = scmp.lt.s32.totalorder (!%p291_p9), %s2847_s13, 1  ;;  %v2561_v2 = vld [vmem:[%s3511_s1 + $0x8] sm:$0xff] (!%p291_p9)   ;;  %v2562_v3 = vld [vmem:[%s3511_s1 + $0x10] sm:$0xff] (!%p291_p9)   ;;  %vm333_vm0 = vcmask (!%p291_p9), 1043456  }
   0xe   : > { %294 = sbr.rel (%p291_p9) target bundleno = 1631 (0x65f), region = 56  ;;  %420 = vmatprep.subr.bf16.mxu0 (!%p291_p9), %v2770_v1  ;;  %552 = vmatprep.subr.bf16.mxu1 (!%p291_p9), %v2770_v1  ;;  %vm334_vm1 = vcmask (!%p291_p9), 130052   ;;  %v2563_v4 = vld [vmem:[%s3511_s1 + $0x18] sm:$0xff] (!%p291_p9)   ;;  %v2569_v5 = vld [vmem:[%s3511_s1 + $0x90] sm:$0xff] (!%p291_p9)   ;;  %v2564_v8 = vld [vmem:[%s3511_s1 + $0x20] sm:$0xff] (!%p291_p9)   ;;  %vm416_vm3 = vcmask (!%p291_p9), 130048  }
   0xf   : > { %421 = vmatpush1.bf16.msra.mxu0 (!%p291_p9), %v2560_v0  ;;  %vm335_vm2 = vmor (!%p291_p9), %vm334_vm1, %vm333_vm0  ;;  %553 = vmatpush1.bf16.msra.mxu1 (!%p291_p9), %v2569_v5  ;;  %v2572_v7 = vld [vmem:[%s3511_s1 + $0x98] sm:$0xff] (!%p291_p9)   ;;  %v2574_v9 = vld [vmem:[%s3511_s1 + $0xa0] sm:$0xff] (!%p291_p9)   ;;  %vm694_vm4 = vcmask (!%p291_p9), 1046528   ;;  %vm595_vm5 = vcmask (!%p291_p9), 1040384   ;;  %s2771_s14 = smov (!%p291_p9), 16   ;;  %vm712_vm6 = vcmask (!%p291_p9), 322688  }
  0x10   : > { %422 = vmatprep.subr.bf16.mxu0 (!%p291_p9), %v2770_v1  ;;  %554 = vmatprep.subr.bf16.mxu1 (!%p291_p9), %v2770_v1  ;;  %v2565_v10 = vld [vmem:[%s3511_s1 + $0x28] sm:$0xff] (!%p291_p9)   ;;  %v2566_v14 = vld [vmem:[%s3511_s1 + $0x30] sm:$0xff] (!%p291_p9)   ;;  %v2567_v16 = vld [vmem:[%s3511_s1 + $0x38] sm:$0xff] (!%p291_p9)   ;;  %vm805_vm7 = vcmask (!%p291_p9), 326656   ;;  %vm1132_vm8 = vcmask (!%p291_p9), 519488   ;;  %vm1237_vm9 = vcmask (!%p291_p9), 523264  }
  0x11   : > { %v2576_v13 = vld [vmem:[%s3511_s1 + $0xa8] sm:$0xff] (!%p291_p9)   ;;  %v2578_v15 = vld [vmem:[%s3511_s1 + $0xb0] sm:$0xff] (!%p291_p9)   ;;  %v2580_v17 = vld [vmem:[%s3511_s1 + $0xb8] sm:$0xff] (!%p291_p9)   ;;  %vm1579_vm10 = vcmask (!%p291_p9), 716288   ;;  %vm1696_vm11 = vcmask (!%p291_p9), 719872   ;;  %vm2071_vm12 = vcmask (!%p291_p9), 913088  }
  0x12   : > { %v2568_v18 = vld [vmem:[%s3511_s1 + $0x40] sm:$0xff] (!%p291_p9)   ;;  %v2573_v20 = vld [vmem:[%s3511_s1 + $0x48] sm:$0xff] (!%p291_p9)   ;;  %v2575_v23 = vld [vmem:[%s3511_s1 + $0x50] sm:$0xff] (!%p291_p9)   ;;  %vm2075_vm13 = vcmask (!%p291_p9), 916484   ;;  %s2515_s28 = sshll.u32 (!%p291_p9), %s2847_s13, 7  ;;  %s2775_s23 = smov (!%p291_p9), [#allocation3]  }
  0x13   : > { %423 = vmatpush1.bf16.msra.mxu0 (!%p291_p9), %v2561_v2  ;;  %555 = vmatpush1.bf16.msra.mxu1 (!%p291_p9), %v2572_v7  ;;  %v2582_v19 = vld [vmem:[%s3511_s1 + $0xc0] sm:$0xff] (!%p291_p9)   ;;  %v2584_v22 = vld [vmem:[%s3511_s1 + $0xc8] sm:$0xff] (!%p291_p9)   ;;  %v2586_v24 = vld [vmem:[%s3511_s1 + $0xd0] sm:$0xff] (!%p291_p9)   ;;  %s3468_s21 = scalar_lea.hbm (!%p291_p9), %s3519_s9, %s2515_s28  ;;  %s2710_s24 = sshll.u32 (!%p291_p9), %s2775_s23, 4  ;;  %s2711_s24 = int_to_ptr.vmem [resolvable:$false] %s2710_s24 }
  0x14   : > { %424 = vmatprep.subr.bf16.mxu0 (!%p291_p9), %v2770_v1  ;;  %556 = vmatprep.subr.bf16.mxu1 (!%p291_p9), %v2770_v1  ;;  %v2577_v25 = vld [vmem:[%s3511_s1 + $0x58] sm:$0xff] (!%p291_p9)   ;;  %v2579_v26 = vld [vmem:[%s3511_s1 + $0x60] sm:$0xff] (!%p291_p9)   ;;  %v2581_v27 = vld [vmem:[%s3511_s1 + $0x68] sm:$0xff] (!%p291_p9)  }
  0x15   : > { %s327_s25 = scalar_select %p326_p10, %s2847_s13, 1  ;;  %v2583_v28 = vld [vmem:[%s3511_s1 + $0x70] sm:$0xff]   ;;  %v2585_v29 = vld [vmem:[%s3511_s1 + $0x78] sm:$0xff]   ;;  %v2587_v30 = vld [vmem:[%s3511_s1 + $0x80] sm:$0xff]  }
  0x16   : > { %v2588_v31 = vld [vmem:[%s3511_s1 + $0x88] sm:$0xff]   ;;  %v2589_v32 = vld [vmem:[%s3513_s3] sm:$0xff]   ;;  %v2592_v35 = vld [vmem:[%s3513_s3 + $0xb0] sm:$0xff]  }
  0x17   : > { %s2510_s26 = sshll.u32 %s327_s25, 3  ;;  %425 = vmatpush1.bf16.msra.mxu0 %v2562_v3  ;;  %557 = vmatpush1.bf16.msra.mxu1 %v2574_v9  ;;  %v2590_v33 = vld [vmem:[%s3513_s3 + $0xa8] sm:$0xff]   ;;  %v2593_v36 = vld [vmem:[%s3513_s3 + $0x10] sm:$0xff]   ;;  %v2594_v37 = vld [vmem:[%s3513_s3 + $0xb8] sm:$0xff]   ;;  %s2774_s25 = smov 88  }
  0x18   : > { %s330_s16 = scalar_lea.vmem %s3510_s0, %s2510_s26  ;;  %426 = vmatprep.subr.bf16.mxu0 %v2770_v1  ;;  %558 = vmatprep.subr.bf16.mxu1 %v2770_v1  ;;  %v2591_v34 = vld [vmem:[%s3513_s3 + $0x8] sm:$0xff]   ;;  %v2595_v38 = vld [vmem:[%s3513_s3 + $0x18] sm:$0xff]   ;;  %v2596_v39 = vld [vmem:[%s3513_s3 + $0xc0] sm:$0xff]   ;;  %s323_s26 = sand.u32 1, %s2760_s10  }
  0x19   : > { %v332_v6 = vld [vmem:[%s330_s16] sm:$0xff]  ;;  %v2598_v41 = vld [vmem:[%s3513_s3 + $0xc8] sm:$0xff]   ;;  %v2600_v43 = vld [vmem:[%s3513_s3 + $0xd0] sm:$0xff]   ;;  %s2772_s16 = smov 40   ;;  %s2156_s27 = sshll.u32 %s323_s26, 3 }
  0x1a   : > { %336 = vst.msk [vmem:[#allocation2] sm:$0xff] %vm335_vm2, %v332_v6  ;;  %v2597_v40 = vld [vmem:[%s3513_s3 + $0x20] sm:$0xff]   ;;  %v2599_v42 = vld [vmem:[%s3513_s3 + $0x28] sm:$0xff]   ;;  %v2601_v44 = vld [vmem:[%s3513_s3 + $0x30] sm:$0xff]   ;;  %s325_s29 = scalar_lea.vmem [#allocation3], %s2156_s27  ;;  %s2079_s22 = scalar_lea.sflag [#allocation4], %s323_s26 }
  0x1b   : > { %427 = vmatpush1.bf16.msra.mxu0 %v2563_v4  ;;  %559 = vmatpush1.bf16.msra.mxu1 %v2576_v13  ;;  %v2602_v45 = vld [vmem:[%s3513_s3 + $0xd8] sm:$0xff]   ;;  %v2604_v47 = vld [vmem:[%s3513_s3 + $0xe0] sm:$0xff]   ;;  %v2606_v57 = vld [vmem:[%s3513_s3 + $0xe8] sm:$0xff]  }
  0x1c   : > { %428 = vmatprep.subr.bf16.mxu0 %v2770_v1  ;;  %560 = vmatprep.subr.bf16.mxu1 %v2770_v1  ;;  %v2603_v46 = vld [vmem:[%s3513_s3 + $0x38] sm:$0xff]   ;;  %v2605_v48 = vld [vmem:[%s3513_s3 + $0x40] sm:$0xff]   ;;  %v2607_v60 = vld [vmem:[%s3513_s3 + $0x48] sm:$0xff]  }
  0x1d   : > { %v2608_v61 = vld [vmem:[%s3513_s3 + $0xf0] sm:$0xff]   ;;  %v2610_v63 = vld [vmem:[%s3513_s3 + $0xf8] ss:$0 sps:$4 sm:$0xff]   ;;  %v2227_v9 = vld [vmem:[%s3512_s2] ss:$0 sm:$0xff] }
  0x1e   : > { %v2609_v62 = vld [vmem:[%s3513_s3 + $0x50] ss:$0 sps:$4 sm:$0xff]   ;;  %v960_v7 = vsel %vm333_vm0, %v2610_v63, 0  ;;  %vm2076_vm14 = vmor %vm2075_vm13, %vm333_vm0 }
  0x1f   : > { %429 = vmatpush1.bf16.msra.mxu0 %v2564_v8  ;;  %561 = vmatpush1.bf16.msra.mxu1 %v2578_v15  ;;  %v810_v0 = vsel %vm333_vm0, %v2609_v62, 0  ;;  %v2646_v62 = vld [vmem:[%s3515_s5 + $0x58] sm:$0xff]  }
  0x20   : > { %430 = vmatprep.subr.bf16.mxu0 %v2770_v1  ;;  %562 = vmatprep.subr.bf16.mxu1 %v2770_v1 }
  0x21   : > { %v337_v11 = vld [vmem:[#allocation2] sm:$0xff] }
  0x22   : > { %v2160_v12 = vcombine.high %v337_v11, %v337_v11  ;;  %v2159_v21 = vcombine.low %v337_v11, %v337_v11 }
  0x23   : > { %431 = vmatpush1.bf16.msra.mxu0 %v2565_v10  ;;  %563 = vmatpush1.bf16.msra.mxu1 %v2580_v17 }
  0x24   : > { %2170 = vmatprep.mubr.msk.bf16.mxu0 %vm416_vm3, %v2160_v12  ;;  %2216 = vmatprep.mubr.msk.bf16.mxu1 %vm416_vm3, %v2160_v12 }
  0x25   : > { %432 = vmatprep.subr.bf16.mxu0 %v2770_v1  ;;  %564 = vmatprep.subr.bf16.mxu1 %v2770_v1 }
  0x27   : > { %433 = vmatpush1.bf16.msra.mxu0 %v2566_v14  ;;  %565 = vmatpush1.bf16.msra.mxu1 %v2582_v19  ;;  %v2614_v19 = vld [vmem:[%s3513_s3 + $0x5c] sm:$0xff]  }
  0x28   : > { %434 = vmatprep.subr.bf16.mxu0 %v2770_v1  ;;  %566 = vmatprep.subr.bf16.mxu1 %v2770_v1 }
  0x2b   : > { %435 = vmatpush1.bf16.msra.mxu0 %v2567_v16  ;;  %567 = vmatpush1.bf16.msra.mxu1 %v2584_v22  ;;  %v2617_v22 = vld [vmem:[%s3513_s3 + $0x74] sm:$0xff]  }
  0x2c   : > { %436 = vmatprep.subr.bf16.mxu0 %v2770_v1  ;;  %568 = vmatprep.subr.bf16.mxu1 %v2770_v1 }
  0x2f   : > { %437 = vmatpush1.bf16.msra.mxu0 %v2568_v18  ;;  %569 = vmatpush1.bf16.msra.mxu1 %v2586_v24  ;;  %v2613_v18 = vld [vmem:[%s3513_s3 + $0x54] sm:$0xff]   ;;  %v2619_v24 = vld [vmem:[%s3513_s3 + $0x84] sm:$0xff]  }
  0x30   : > { %651 = vmatprep.subr.bf16.mxu0 %v2770_v1  ;;  %812 = vmatprep.subr.bf16.mxu1 %v2770_v1 }
  0x32   : > { %453 = vmatmul.mubr.bf16.vlgmr.msra.gmra.mrb[0].mxu0 %v2159_v21  ;;  %585 = vmatmul.mubr.bf16.vlgmr.msra.gmra.mrb[0].mxu1 %v2159_v21 }
  0x33   : > { %652 = vmatpush1.bf16.msra.mxu0 %v2573_v20  ;;  %2226 = vmatprep.mubr.msk.bf16.mxu0 %vm416_vm3, %v2160_v12  ;;  %v2615_v20 = vld [vmem:[%s3513_s3 + $0x64] sm:$0xff]  }
  0x34   : > { %653 = vmatprep.subr.bf16.mxu0 %v2770_v1  ;;  %813 = vmatpush1.bf16.msra.mxu1 %v2589_v32  ;;  %v2626_v32 = vld [vmem:[%s3515_s5 + $0x8] sm:$0xff]  }
  0x35   : > { %814 = vmatprep.subr.bf16.mxu1 %v2770_v1 }
  0x37   : > { %654 = vmatpush1.bf16.msra.mxu0 %v2575_v23  ;;  %v2618_v23 = vld [vmem:[%s3513_s3 + $0x7c] sm:$0xff]  }
  0x38   : > { %655 = vmatprep.subr.bf16.mxu0 %v2770_v1  ;;  %815 = vmatpush1.bf16.msra.mxu1 %v2591_v34  ;;  %v2628_v34 = vld [vmem:[%s3515_s5 + $0x10] sm:$0xff]  }
  0x39   : > { %816 = vmatprep.subr.bf16.mxu1 %v2770_v1 }
  0x3b   : > { %656 = vmatpush1.bf16.msra.mxu0 %v2577_v25  ;;  %v2620_v25 = vld [vmem:[%s3513_s3 + $0x8c] sm:$0xff]  }
  0x3c   : > { %657 = vmatprep.subr.bf16.mxu0 %v2770_v1  ;;  %817 = vmatpush1.bf16.msra.mxu1 %v2593_v36  ;;  %v2630_v36 = vld [vmem:[%s3515_s5 + $0x18] sm:$0xff]  }
  0x3d   : > { %818 = vmatprep.subr.bf16.mxu1 %v2770_v1 }
  0x3f   : > { %658 = vmatpush1.bf16.msra.mxu0 %v2579_v26  ;;  %v2621_v26 = vld [vmem:[%s3513_s3 + $0x94] sm:$0xff]  }
  0x40   : > { %659 = vmatprep.subr.bf16.mxu0 %v2770_v1  ;;  %819 = vmatpush1.bf16.msra.mxu1 %v2595_v38  ;;  %v2632_v38 = vld [vmem:[%s3515_s5 + $0x20] sm:$0xff]  }
  0x41   : > { %820 = vmatprep.subr.bf16.mxu1 %v2770_v1 }
  0x43   : > { %660 = vmatpush1.bf16.msra.mxu0 %v2581_v27  ;;  %v2622_v27 = vld [vmem:[%s3513_s3 + $0x9c] sm:$0xff]  }
  0x44   : > { %661 = vmatprep.subr.bf16.mxu0 %v2770_v1  ;;  %821 = vmatpush1.bf16.msra.mxu1 %v2597_v40  ;;  %v2634_v40 = vld [vmem:[%s3515_s5 + $0x28] sm:$0xff]  }
  0x45   : > { %822 = vmatprep.subr.bf16.mxu1 %v2770_v1 }
  0x47   : > { %662 = vmatpush1.bf16.msra.mxu0 %v2583_v28  ;;  %v2623_v28 = vld [vmem:[%s3513_s3 + $0xa4] ss:$0 sps:$4 sm:$0xff]  }
  0x48   : > { %663 = vmatprep.subr.bf16.mxu0 %v2770_v1  ;;  %823 = vmatpush1.bf16.msra.mxu1 %v2599_v42  ;;  %v2636_v42 = vld [vmem:[%s3515_s5 + $0x30] sm:$0xff]  }
  0x49   : > { %824 = vmatprep.subr.bf16.mxu1 %v2770_v1 }
  0x4b   : > { %664 = vmatpush1.bf16.msra.mxu0 %v2585_v29  ;;  %v1070_v29 = vsel %vm333_vm0, %v2623_v28, 0  ;;  %v2662_v28 = vld [vmem:[%s3517_s7] sm:$0xff]  }
  0x4c   : > { %665 = vmatprep.subr.bf16.mxu0 %v2770_v1  ;;  %825 = vmatpush1.bf16.msra.mxu1 %v2601_v44  ;;  %v2638_v44 = vld [vmem:[%s3515_s5 + $0x38] sm:$0xff]  }
  0x4d   : > { %826 = vmatprep.subr.bf16.mxu1 %v2770_v1 }
  0x4f   : > { %666 = vmatpush1.bf16.msra.mxu0 %v2587_v30  ;;  %v2624_v30 = vld [vmem:[%s3515_s5] sm:$0xff]  }
  0x50   : > { %667 = vmatprep.subr.bf16.mxu0 %v2770_v1  ;;  %827 = vmatpush1.bf16.msra.mxu1 %v2603_v46  ;;  %v2640_v46 = vld [vmem:[%s3515_s5 + $0x40] sm:$0xff]  }
  0x51   : > { %828 = vmatprep.subr.bf16.mxu1 %v2770_v1 }
  0x53   : > { %668 = vmatpush1.bf16.msra.mxu0 %v2588_v31  ;;  %v2625_v31 = vld [vmem:[%s3515_s5 + $0xc0] sm:$0xff]  }
  0x54   : > { %962 = vmatprep.subr.bf16.mxu0 %v2770_v1  ;;  %829 = vmatpush1.bf16.msra.mxu1 %v2605_v48  ;;  %v2642_v48 = vld [vmem:[%s3515_s5 + $0x48] sm:$0xff]  }
  0x55   : > { %830 = vmatprep.subr.bf16.mxu1 %v2770_v1 }
  0x56   : > { %684 = vmatmul.mubr.bf16.vlgmr.msra.gmra.mrb[4].mxu0 %v2159_v21  ;;  %v2616_v21 = vld [vmem:[%s3513_s3 + $0x6c] sm:$0xff]  }
  0x57   : > { %963 = vmatpush1.bf16.msra.mxu0 %v2590_v33  ;;  %v2627_v33 = vld [vmem:[%s3515_s5 + $0xc8] sm:$0xff]  }
  0x58   : > { %964 = vmatprep.subr.bf16.mxu0 %v2770_v1  ;;  %831 = vmatpush1.bf16.msra.mxu1 %v2607_v60  ;;  %v2645_v60 = vld [vmem:[%s3515_s5 + $0x110] sm:$0xff]  }
  0x59   : > { %832 = vmatprep.subr.bf16.mxu1 %v2770_v1 }
  0x5b   : > { %965 = vmatpush1.bf16.msra.mxu0 %v2592_v35  ;;  %v2629_v35 = vld [vmem:[%s3515_s5 + $0xd0] sm:$0xff]  }
  0x5c   : > { %966 = vmatprep.subr.bf16.mxu0 %v2770_v1  ;;  %833 = vmatpush1.bf16.msra.mxu1 %v810_v0 }
  0x5d   : > { %1072 = vmatprep.subr.bf16.mxu1 %v2770_v1 }
  0x5f   : > { %967 = vmatpush1.bf16.msra.mxu0 %v2594_v37  ;;  %v2631_v37 = vld [vmem:[%s3515_s5 + $0xd8] sm:$0xff]  }
  0x60   : > { %968 = vmatprep.subr.bf16.mxu0 %v2770_v1 }
  0x63   : > { %969 = vmatpush1.bf16.msra.mxu0 %v2596_v39  ;;  %v2633_v39 = vld [vmem:[%s3515_s5 + $0xe0] sm:$0xff]  }
  0x64   : > { %970 = vmatprep.subr.bf16.mxu0 %v2770_v1 }
  0x67   : > { %971 = vmatpush1.bf16.msra.mxu0 %v2598_v41  ;;  %v2635_v41 = vld [vmem:[%s3515_s5 + $0xe8] sm:$0xff]  }
  0x68   : > { %972 = vmatprep.subr.bf16.mxu0 %v2770_v1 }
  0x6b   : > { %973 = vmatpush1.bf16.msra.mxu0 %v2600_v43  ;;  %v2637_v43 = vld [vmem:[%s3515_s5 + $0xf0] sm:$0xff]  }
  0x6c   : > { %974 = vmatprep.subr.bf16.mxu0 %v2770_v1 }
  0x6f   : > { %975 = vmatpush1.bf16.msra.mxu0 %v2602_v45  ;;  %v2639_v45 = vld [vmem:[%s3515_s5 + $0xf8] sm:$0xff]  }
  0x70   : > { %976 = vmatprep.subr.bf16.mxu0 %v2770_v1 }
  0x73   : > { %977 = vmatpush1.bf16.msra.mxu0 %v2604_v47  ;;  %v2641_v47 = vld [vmem:[%s3515_s5 + $0x100] sm:$0xff]  }
  0x74   : > { %978 = vmatprep.subr.bf16.mxu0 %v2770_v1 }
  0x77   : > { %979 = vmatpush1.bf16.msra.mxu0 %v2606_v57  ;;  %v2643_v57 = vld [vmem:[%s3515_s5 + $0x108] sm:$0xff]  }
  0x78   : > { %980 = vmatprep.subr.bf16.mxu0 %v2770_v1 }
  0x7b   : > { %981 = vmatpush1.bf16.msra.mxu0 %v2608_v61 }
  0x7c   : > { %982 = vmatprep.subr.bf16.mxu0 %v2770_v1 }
  0x7f   : > { %983 = vmatpush1.bf16.msra.mxu0 %v960_v7  ;;  %v2309_v7 = vld [vmem:[%s3514_s4] ss:$0 sm:$0xff] }
  0x80   : > { %1241 = vmatprep.subr.bf16.mxu0 %v2770_v1 }
 0x105   : > { %v454_v49 = vpop.f32.mrb[0].mxu0  ;;  %v586_v53 = vpop.f32.mrb[0].mxu1 }
 0x106   : > { %v456_v50 = vpop.f32.mrb[1].mxu0  ;;  %v588_v54 = vpop.f32.mrb[1].mxu1  ;;  %v593_v58 = vrot.slane %v454_v49, 7  ;;  %v692_v59 = vrot.slane %v586_v53, 1 }
 0x107   : > { %v457_v51 = vpop.f32.mrb[2].mxu0  ;;  %v589_v55 = vpop.f32.mrb[2].mxu1 }
 0x108   : > { %v458_v52 = vpop.f32.mrb[3].mxu0  ;;  %v590_v56 = vpop.f32.mrb[3].mxu1  ;;  %v695_v2 = vsel %vm694_vm4, %v692_v59, 0.0  ;;  %v596_v3 = vsel %vm595_vm5, 0.0, %v593_v58  ;;  %v2644_v59 = vld [vmem:[%s3515_s5 + $0x50] sm:$0xff]  }
 0x129   : > { %v685_v4 = vpop.f32.mrb[4].mxu0 }
 0x12a   : > { %v686_v5 = vadd.f32 %v685_v4, %v596_v3  ;;  %v687_v6 = vpop.f32.mrb[5].mxu0 }
 0x12b   : > { %v688_v8 = vpop.f32.mrb[6].mxu0 }
 0x12c   : > { %v696_v10 = vadd.f32 %v695_v2, %v686_v5  ;;  %v689_v11 = vpop.f32.mrb[7].mxu0  ;;  %v2647_v2 = vld [vmem:[%s3515_s5 + $0x118] sm:$0xff]  }
 0x12e   : > { %v704_v12 = vadd.f32 %v2227_v9, %v696_v10 }
 0x130   : > { %v2511_v13 = vpack.c.bf16 %v704_v12, %v704_v12 }
 0x132   : > { %709 = vrot.lane.b32.xlu0 %v2511_v13, %s2771_s14  ;;  %s2773_s14 = smov 64  }
 0x1a4   : > { %v710_v14 = vpop.permute.xlu0 %709 }
 0x1a5   : > { %713 = vst.msk [vmem:[#allocation2 + $0x4] sm:$0xf] %vm712_vm6, %v710_v14 }
 0x1ac   : > { %v714_v15 = vld [vmem:[#allocation2] sm:$0xff] }
 0x1ad   : > { %v2230_v16 = vcombine.high %v714_v15, %v714_v15  ;;  %v2229_v17 = vcombine.low %v714_v15, %v714_v15 }
 0x1af   : > { %2242 = vmatprep.mubr.msk.bf16.mxu1 %vm805_vm7, %v2230_v16  ;;  %2296 = vmatprep.mubr.msk.bf16.mxu0 %vm805_vm7, %v2230_v16 }
 0x1b0   : > { %845 = vmatmul.mubr.bf16.vlgmr.msra.gmra.mrb[4].mxu1 %v2229_v17  ;;  %995 = vmatmul.mubr.bf16.vlgmr.msra.gmra.mrb[8].mxu0 %v2229_v17 }
 0x1b1   : > { %1073 = vmatpush1.bf16.msra.mxu1 %v2613_v18  ;;  %2308 = vmatprep.mubr.msk.bf16.mxu1 %vm805_vm7, %v2230_v16  ;;  %v2650_v16 = vld [vmem:[%s3515_s5 + $0x60] sm:$0xff]   ;;  %v2652_v18 = vld [vmem:[%s3515_s5 + $0x70] sm:$0xff]  }
 0x1b2   : > { %1074 = vmatprep.subr.bf16.mxu1 %v2770_v1  ;;  %1242 = vmatpush1.bf16.msra.mxu0 %v2624_v30  ;;  %v2664_v30 = vld [vmem:[%s3517_s7 + $0x8] sm:$0xff]  }
 0x1b3   : > { %1243 = vmatprep.subr.bf16.mxu0 %v2770_v1 }
 0x1b5   : > { %1075 = vmatpush1.bf16.msra.mxu1 %v2614_v19  ;;  %v2653_v19 = vld [vmem:[%s3515_s5 + $0x78] sm:$0xff]  }
 0x1b6   : > { %1076 = vmatprep.subr.bf16.mxu1 %v2770_v1  ;;  %1244 = vmatpush1.bf16.msra.mxu0 %v2626_v32  ;;  %v2666_v32 = vld [vmem:[%s3517_s7 + $0x10] sm:$0xff]  }
 0x1b7   : > { %1245 = vmatprep.subr.bf16.mxu0 %v2770_v1 }
 0x1b9   : > { %1077 = vmatpush1.bf16.msra.mxu1 %v2615_v20  ;;  %v2654_v20 = vld [vmem:[%s3515_s5 + $0x80] sm:$0xff]  }
 0x1ba   : > { %1078 = vmatprep.subr.bf16.mxu1 %v2770_v1  ;;  %1246 = vmatpush1.bf16.msra.mxu0 %v2628_v34  ;;  %v2668_v34 = vld [vmem:[%s3517_s7 + $0x18] sm:$0xff]  }
 0x1bb   : > { %1247 = vmatprep.subr.bf16.mxu0 %v2770_v1 }
 0x1bd   : > { %1079 = vmatpush1.bf16.msra.mxu1 %v2616_v21  ;;  %v2655_v21 = vld [vmem:[%s3515_s5 + $0x88] sm:$0xff]  }
 0x1be   : > { %1080 = vmatprep.subr.bf16.mxu1 %v2770_v1  ;;  %1248 = vmatpush1.bf16.msra.mxu0 %v2630_v36  ;;  %v2670_v36 = vld [vmem:[%s3517_s7 + $0x20] sm:$0xff]  }
 0x1bf   : > { %1249 = vmatprep.subr.bf16.mxu0 %v2770_v1 }
 0x1c1   : > { %1081 = vmatpush1.bf16.msra.mxu1 %v2617_v22  ;;  %v2656_v22 = vld [vmem:[%s3515_s5 + $0x90] sm:$0xff]  }
 0x1c2   : > { %1082 = vmatprep.subr.bf16.mxu1 %v2770_v1  ;;  %1250 = vmatpush1.bf16.msra.mxu0 %v2632_v38  ;;  %v2672_v38 = vld [vmem:[%s3517_s7 + $0x28] sm:$0xff]  }
 0x1c3   : > { %1251 = vmatprep.subr.bf16.mxu0 %v2770_v1 }
 0x1c5   : > { %1083 = vmatpush1.bf16.msra.mxu1 %v2618_v23  ;;  %v2657_v23 = vld [vmem:[%s3515_s5 + $0x98] sm:$0xff]  }
 0x1c6   : > { %1084 = vmatprep.subr.bf16.mxu1 %v2770_v1  ;;  %1252 = vmatpush1.bf16.msra.mxu0 %v2634_v40  ;;  %v2674_v40 = vld [vmem:[%s3517_s7 + $0x30] sm:$0xff]  }
 0x1c7   : > { %1253 = vmatprep.subr.bf16.mxu0 %v2770_v1 }
 0x1c9   : > { %1085 = vmatpush1.bf16.msra.mxu1 %v2619_v24  ;;  %v2658_v24 = vld [vmem:[%s3515_s5 + $0xa0] sm:$0xff]  }
 0x1ca   : > { %1086 = vmatprep.subr.bf16.mxu1 %v2770_v1  ;;  %1254 = vmatpush1.bf16.msra.mxu0 %v2636_v42  ;;  %v2676_v42 = vld [vmem:[%s3517_s7 + $0x38] sm:$0xff]  }
 0x1cb   : > { %1255 = vmatprep.subr.bf16.mxu0 %v2770_v1 }
 0x1cd   : > { %1087 = vmatpush1.bf16.msra.mxu1 %v2620_v25  ;;  %v2659_v25 = vld [vmem:[%s3515_s5 + $0xa8] sm:$0xff]  }
 0x1ce   : > { %1088 = vmatprep.subr.bf16.mxu1 %v2770_v1  ;;  %1256 = vmatpush1.bf16.msra.mxu0 %v2638_v44  ;;  %v2678_v44 = vld [vmem:[%s3517_s7 + $0x40] sm:$0xff]  }
 0x1cf   : > { %1257 = vmatprep.subr.bf16.mxu0 %v2770_v1 }
 0x1d1   : > { %1089 = vmatpush1.bf16.msra.mxu1 %v2621_v26  ;;  %v2660_v26 = vld [vmem:[%s3515_s5 + $0xb0] sm:$0xff]  }
 0x1d2   : > { %1090 = vmatprep.subr.bf16.mxu1 %v2770_v1  ;;  %1258 = vmatpush1.bf16.msra.mxu0 %v2640_v46  ;;  %v2680_v46 = vld [vmem:[%s3517_s7 + $0x48] sm:$0xff]  }
 0x1d3   : > { %1259 = vmatprep.subr.bf16.mxu0 %v2770_v1 }
 0x1d5   : > { %1091 = vmatpush1.bf16.msra.mxu1 %v2622_v27  ;;  %v2661_v27 = vld [vmem:[%s3515_s5 + $0xb8] sm:$0xff]  }
 0x1d6   : > { %1092 = vmatprep.subr.bf16.mxu1 %v2770_v1  ;;  %1260 = vmatpush1.bf16.msra.mxu0 %v2642_v48  ;;  %v2682_v48 = vld [vmem:[%s3517_s7 + $0x50] sm:$0xff]  }
 0x1d7   : > { %1261 = vmatprep.subr.bf16.mxu0 %v2770_v1 }
 0x1d9   : > { %1093 = vmatpush1.bf16.msra.mxu1 %v1070_v29  ;;  %v2663_v29 = vld [vmem:[%s3517_s7 + $0xd8] sm:$0xff]  }
 0x1da   : > { %1403 = vmatprep.subr.bf16.mxu1 %v2770_v1  ;;  %1262 = vmatpush1.bf16.msra.mxu0 %v2644_v59  ;;  %v2685_v59 = vld [vmem:[%s3517_s7 + $0x130] sm:$0xff]  }
 0x1db   : > { %1263 = vmatprep.subr.bf16.mxu0 %v2770_v1 }
 0x1dc   : > { %1105 = vmatmul.mubr.bf16.vlgmr.msra.gmra.mrb[8].mxu1 %v2229_v17  ;;  %v2651_v17 = vld [vmem:[%s3515_s5 + $0x68] sm:$0xff]  }
 0x1dd   : > { %1404 = vmatpush1.bf16.msra.mxu1 %v2625_v31  ;;  %v2665_v31 = vld [vmem:[%s3517_s7 + $0xe0] sm:$0xff]  }
 0x1de   : > { %1405 = vmatprep.subr.bf16.mxu1 %v2770_v1  ;;  %1264 = vmatpush1.bf16.msra.mxu0 %v2646_v62  ;;  %v2687_v62 = vld [vmem:[%s3517_s7 + $0x138] sm:$0xff]  }
 0x1df   : > { %1519 = vmatprep.subr.bf16.mxu0 %v2770_v1 }
 0x1e1   : > { %1406 = vmatpush1.bf16.msra.mxu1 %v2627_v33  ;;  %v2667_v33 = vld [vmem:[%s3517_s7 + $0xe8] sm:$0xff]  }
 0x1e2   : > { %1407 = vmatprep.subr.bf16.mxu1 %v2770_v1 }
 0x1e5   : > { %1408 = vmatpush1.bf16.msra.mxu1 %v2629_v35  ;;  %v2669_v35 = vld [vmem:[%s3517_s7 + $0xf0] sm:$0xff]  }
 0x1e6   : > { %1409 = vmatprep.subr.bf16.mxu1 %v2770_v1 }
 0x1e9   : > { %1410 = vmatpush1.bf16.msra.mxu1 %v2631_v37  ;;  %v2671_v37 = vld [vmem:[%s3517_s7 + $0xf8] sm:$0xff]  }
 0x1ea   : > { %1411 = vmatprep.subr.bf16.mxu1 %v2770_v1 }
 0x1ed   : > { %1412 = vmatpush1.bf16.msra.mxu1 %v2633_v39  ;;  %v2673_v39 = vld [vmem:[%s3517_s7 + $0x100] sm:$0xff]  }
 0x1ee   : > { %1413 = vmatprep.subr.bf16.mxu1 %v2770_v1 }
 0x1f1   : > { %1414 = vmatpush1.bf16.msra.mxu1 %v2635_v41  ;;  %v2675_v41 = vld [vmem:[%s3517_s7 + $0x108] sm:$0xff]  }
 0x1f2   : > { %1415 = vmatprep.subr.bf16.mxu1 %v2770_v1 }
 0x1f5   : > { %1416 = vmatpush1.bf16.msra.mxu1 %v2637_v43  ;;  %v2677_v43 = vld [vmem:[%s3517_s7 + $0x110] sm:$0xff]  }
 0x1f6   : > { %1417 = vmatprep.subr.bf16.mxu1 %v2770_v1 }
 0x1f9   : > { %1418 = vmatpush1.bf16.msra.mxu1 %v2639_v45  ;;  %v2679_v45 = vld [vmem:[%s3517_s7 + $0x118] sm:$0xff]  }
 0x1fa   : > { %1419 = vmatprep.subr.bf16.mxu1 %v2770_v1 }
 0x1fd   : > { %1420 = vmatpush1.bf16.msra.mxu1 %v2641_v47  ;;  %v2681_v47 = vld [vmem:[%s3517_s7 + $0x120] sm:$0xff]  }
 0x1fe   : > { %1421 = vmatprep.subr.bf16.mxu1 %v2770_v1 }
 0x201   : > { %1422 = vmatpush1.bf16.msra.mxu1 %v2643_v57 }
 0x202   : > { %1423 = vmatprep.subr.bf16.mxu1 %v2770_v1 }
 0x205   : > { %1424 = vmatpush1.bf16.msra.mxu1 %v2645_v60 }
 0x206   : > { %1425 = vmatprep.subr.bf16.mxu1 %v2770_v1 }
 0x209   : > { %1426 = vmatpush1.bf16.msra.mxu1 %v2647_v2 }
 0x20a   : > { %1703 = vmatprep.subr.bf16.mxu1 %v2770_v1 }
 0x283   : > { %v846_v49 = vpop.f32.mrb[4].mxu1  ;;  %v996_v50 = vpop.f32.mrb[8].mxu0 }
 0x284   : > { %v848_v51 = vpop.f32.mrb[5].mxu1  ;;  %v998_v52 = vpop.f32.mrb[9].mxu0  ;;  %v1003_v58 = vrot.slane %v846_v49, 7  ;;  %v1113_v61 = vrot.slane %v996_v50, 1  ;;  %v2683_v49 = vld [vmem:[%s3517_s7 + $0x128] sm:$0xff]   ;;  %v2684_v50 = vld [vmem:[%s3517_s7 + $0x58] sm:$0xff]  }
 0x285   : > { %v849_v53 = vpop.f32.mrb[6].mxu1  ;;  %v999_v54 = vpop.f32.mrb[10].mxu0 }
 0x286   : > { %v850_v55 = vpop.f32.mrb[7].mxu1  ;;  %v1000_v56 = vpop.f32.mrb[11].mxu0  ;;  %v1005_v63 = vsel %vm595_vm5, 0.0, %v1003_v58  ;;  %v1115_v5 = vsel %vm694_vm4, %v1113_v61, 0.0  ;;  %v2686_v61 = vld [vmem:[%s3517_s7 + $0x60] sm:$0xff]  }
 0x2af   : > { %v1106_v0 = vpop.f32.mrb[8].mxu1 }
 0x2b0   : > { %v1107_v3 = vadd.f32 %v1106_v0, %v1005_v63  ;;  %v1108_v4 = vpop.f32.mrb[9].mxu1  ;;  %v2688_v63 = vld [vmem:[%s3517_s7 + $0x68] ss:$0 sps:$4 sm:$0xff]   ;;  %v2689_v0 = vld [vmem:[%s3517_s7 + $0x140] ss:$0 sps:$4 sm:$0xff]  }
 0x2b1   : > { %v1109_v6 = vpop.f32.mrb[10].mxu1 }
 0x2b2   : > { %v1116_v8 = vadd.f32 %v1115_v5, %v1107_v3  ;;  %v1110_v9 = vpop.f32.mrb[11].mxu1  ;;  %v1701_v3 = vsel %vm333_vm0, %v2688_v63, 0 }
 0x2b4   : > { %v1124_v10 = vadd.f32 %v2309_v7, %v1116_v8  ;;  %v1881_v8 = vsel %vm333_vm0, %v2689_v0, 0 }
 0x2b6   : > { %v2512_v11 = vpack.c.bf16 %v1124_v10, %v1124_v10 }
 0x2b8   : > { %1129 = vrot.lane.b32.xlu0 %v2512_v11, %s2772_s16  ;;  %v2400_v11 = vld [vmem:[%s3516_s6] ss:$0 sm:$0xff] }
 0x32a   : > { %v1130_v12 = vpop.permute.xlu0 %1129 }
 0x32b   : > { %1133 = vst.msk [vmem:[#allocation2 + $0x4] sm:$0xf] %vm1132_vm8, %v1130_v12 }
 0x332   : > { %v1134_v13 = vld [vmem:[#allocation2] sm:$0xff] }
 0x333   : > { %v2312_v14 = vcombine.high %v1134_v13, %v1134_v13  ;;  %v2311_v15 = vcombine.low %v1134_v13, %v1134_v13 }
 0x335   : > { %2325 = vmatprep.mubr.msk.bf16.mxu0 %vm1237_vm9, %v2312_v14  ;;  %2386 = vmatprep.mubr.msk.bf16.mxu1 %vm1237_vm9, %v2312_v14 }
 0x336   : > { %1274 = vmatmul.mubr.bf16.vlgmr.msra.gmra.mrb[12].mxu0 %v2311_v15  ;;  %1436 = vmatmul.mubr.bf16.vlgmr.msra.gmra.mrb[12].mxu1 %v2311_v15 }
 0x337   : > { %1520 = vmatpush1.bf16.msra.mxu0 %v2650_v16  ;;  %2399 = vmatprep.mubr.msk.bf16.mxu0 %vm1237_vm9, %v2312_v14 }
 0x338   : > { %1521 = vmatprep.subr.bf16.mxu0 %v2770_v1  ;;  %1704 = vmatpush1.bf16.msra.mxu1 %v2662_v28  ;;  %v2700_v28 = vld [vmem:[%s3517_s7 + $0xac] sm:$0xff]  }
 0x339   : > { %1705 = vmatprep.subr.bf16.mxu1 %v2770_v1 }
 0x33b   : > { %1522 = vmatpush1.bf16.msra.mxu0 %v2651_v17 }
 0x33c   : > { %1523 = vmatprep.subr.bf16.mxu0 %v2770_v1  ;;  %1706 = vmatpush1.bf16.msra.mxu1 %v2664_v30  ;;  %v2702_v30 = vld [vmem:[%s3517_s7 + $0xbc] sm:$0xff]  }
 0x33d   : > { %1707 = vmatprep.subr.bf16.mxu1 %v2770_v1 }
 0x33f   : > { %1524 = vmatpush1.bf16.msra.mxu0 %v2652_v18 }
 0x340   : > { %1525 = vmatprep.subr.bf16.mxu0 %v2770_v1  ;;  %1708 = vmatpush1.bf16.msra.mxu1 %v2666_v32  ;;  %v2704_v32 = vld [vmem:[%s3517_s7 + $0xcc] sm:$0xff]  }
 0x341   : > { %1709 = vmatprep.subr.bf16.mxu1 %v2770_v1 }
 0x343   : > { %1526 = vmatpush1.bf16.msra.mxu0 %v2653_v19 }
 0x344   : > { %1527 = vmatprep.subr.bf16.mxu0 %v2770_v1  ;;  %1710 = vmatpush1.bf16.msra.mxu1 %v2668_v34 }
 0x345   : > { %1711 = vmatprep.subr.bf16.mxu1 %v2770_v1 }
 0x347   : > { %1528 = vmatpush1.bf16.msra.mxu0 %v2654_v20  ;;  %v2692_v20 = vld [vmem:[%s3517_s7 + $0x6c] sm:$0xff]  }
 0x348   : > { %1529 = vmatprep.subr.bf16.mxu0 %v2770_v1  ;;  %1712 = vmatpush1.bf16.msra.mxu1 %v2670_v36 }
 0x349   : > { %1713 = vmatprep.subr.bf16.mxu1 %v2770_v1 }
 0x34b   : > { %1530 = vmatpush1.bf16.msra.mxu0 %v2655_v21  ;;  %v2693_v21 = vld [vmem:[%s3517_s7 + $0x74] sm:$0xff]  }
 0x34c   : > { %1531 = vmatprep.subr.bf16.mxu0 %v2770_v1  ;;  %1714 = vmatpush1.bf16.msra.mxu1 %v2672_v38 }
 0x34d   : > { %1715 = vmatprep.subr.bf16.mxu1 %v2770_v1 }
 0x34f   : > { %1532 = vmatpush1.bf16.msra.mxu0 %v2656_v22  ;;  %v2694_v22 = vld [vmem:[%s3517_s7 + $0x7c] sm:$0xff]  }
 0x350   : > { %1533 = vmatprep.subr.bf16.mxu0 %v2770_v1  ;;  %1716 = vmatpush1.bf16.msra.mxu1 %v2674_v40 }
 0x351   : > { %1717 = vmatprep.subr.bf16.mxu1 %v2770_v1 }
 0x353   : > { %1534 = vmatpush1.bf16.msra.mxu0 %v2657_v23  ;;  %v2695_v23 = vld [vmem:[%s3517_s7 + $0x84] sm:$0xff]  }
 0x354   : > { %1535 = vmatprep.subr.bf16.mxu0 %v2770_v1  ;;  %1718 = vmatpush1.bf16.msra.mxu1 %v2676_v42 }
 0x355   : > { %1719 = vmatprep.subr.bf16.mxu1 %v2770_v1 }
 0x357   : > { %1536 = vmatpush1.bf16.msra.mxu0 %v2658_v24  ;;  %v2696_v24 = vld [vmem:[%s3517_s7 + $0x8c] sm:$0xff]  }
 0x358   : > { %1537 = vmatprep.subr.bf16.mxu0 %v2770_v1  ;;  %1720 = vmatpush1.bf16.msra.mxu1 %v2678_v44 }
 0x359   : > { %1721 = vmatprep.subr.bf16.mxu1 %v2770_v1 }
 0x35b   : > { %1538 = vmatpush1.bf16.msra.mxu0 %v2659_v25  ;;  %v2697_v25 = vld [vmem:[%s3517_s7 + $0x94] sm:$0xff]  }
 0x35c   : > { %1539 = vmatprep.subr.bf16.mxu0 %v2770_v1  ;;  %1722 = vmatpush1.bf16.msra.mxu1 %v2680_v46 }
 0x35d   : > { %1723 = vmatprep.subr.bf16.mxu1 %v2770_v1 }
 0x35f   : > { %1540 = vmatpush1.bf16.msra.mxu0 %v2660_v26  ;;  %v2698_v26 = vld [vmem:[%s3517_s7 + $0x9c] sm:$0xff]  }
 0x360   : > { %1541 = vmatprep.subr.bf16.mxu0 %v2770_v1  ;;  %1724 = vmatpush1.bf16.msra.mxu1 %v2682_v48 }
 0x361   : > { %1725 = vmatprep.subr.bf16.mxu1 %v2770_v1 }
 0x363   : > { %1542 = vmatpush1.bf16.msra.mxu0 %v2661_v27  ;;  %v2699_v27 = vld [vmem:[%s3517_s7 + $0xa4] sm:$0xff]  }
 0x364   : > { %1883 = vmatprep.subr.bf16.mxu0 %v2770_v1  ;;  %1726 = vmatpush1.bf16.msra.mxu1 %v2684_v50 }
 0x365   : > { %1727 = vmatprep.subr.bf16.mxu1 %v2770_v1 }
 0x366   : > { %1552 = vmatmul.mubr.bf16.vlgmr.msra.gmra.mrb[16].mxu0 %v2311_v15 }
 0x367   : > { %1884 = vmatpush1.bf16.msra.mxu0 %v2663_v29  ;;  %v2701_v29 = vld [vmem:[%s3517_s7 + $0xb4] sm:$0xff]  }
 0x368   : > { %1885 = vmatprep.subr.bf16.mxu0 %v2770_v1  ;;  %1728 = vmatpush1.bf16.msra.mxu1 %v2686_v61 }
 0x369   : > { %1729 = vmatprep.subr.bf16.mxu1 %v2770_v1 }
 0x36b   : > { %1886 = vmatpush1.bf16.msra.mxu0 %v2665_v31  ;;  %v2703_v31 = vld [vmem:[%s3517_s7 + $0xc4] sm:$0xff]  }
 0x36c   : > { %1887 = vmatprep.subr.bf16.mxu0 %v2770_v1  ;;  %1730 = vmatpush1.bf16.msra.mxu1 %v1701_v3 }
 0x36d   : > { %2011 = vmatprep.subr.bf16.mxu1 %v2770_v1 }
 0x36f   : > { %1888 = vmatpush1.bf16.msra.mxu0 %v2667_v33  ;;  %v2705_v33 = vld [vmem:[%s3517_s7 + $0xd4] ss:$0 sps:$4 sm:$0xff]  }
 0x370   : > { %1889 = vmatprep.subr.bf16.mxu0 %v2770_v1  ;;  %v2009_v34 = vsel %vm333_vm0, %v2705_v33, 0 }
 0x373   : > { %1890 = vmatpush1.bf16.msra.mxu0 %v2669_v35 }
 0x374   : > { %1891 = vmatprep.subr.bf16.mxu0 %v2770_v1 }
 0x377   : > { %1892 = vmatpush1.bf16.msra.mxu0 %v2671_v37 }
 0x378   : > { %1893 = vmatprep.subr.bf16.mxu0 %v2770_v1 }
 0x37b   : > { %1894 = vmatpush1.bf16.msra.mxu0 %v2673_v39 }
 0x37c   : > { %1895 = vmatprep.subr.bf16.mxu0 %v2770_v1 }
 0x37f   : > { %1896 = vmatpush1.bf16.msra.mxu0 %v2675_v41 }
 0x380   : > { %1897 = vmatprep.subr.bf16.mxu0 %v2770_v1 }
 0x383   : > { %1898 = vmatpush1.bf16.msra.mxu0 %v2677_v43 }
 0x384   : > { %1899 = vmatprep.subr.bf16.mxu0 %v2770_v1 }
 0x387   : > { %1900 = vmatpush1.bf16.msra.mxu0 %v2679_v45 }
 0x388   : > { %1901 = vmatprep.subr.bf16.mxu0 %v2770_v1 }
 0x38b   : > { %1902 = vmatpush1.bf16.msra.mxu0 %v2681_v47 }
 0x38c   : > { %1903 = vmatprep.subr.bf16.mxu0 %v2770_v1 }
 0x38f   : > { %1904 = vmatpush1.bf16.msra.mxu0 %v2683_v49 }
 0x390   : > { %1905 = vmatprep.subr.bf16.mxu0 %v2770_v1 }
 0x393   : > { %1906 = vmatpush1.bf16.msra.mxu0 %v2685_v59 }
 0x394   : > { %1907 = vmatprep.subr.bf16.mxu0 %v2770_v1 }
 0x397   : > { %1908 = vmatpush1.bf16.msra.mxu0 %v2687_v62 }
 0x398   : > { %1909 = vmatprep.subr.bf16.mxu0 %v2770_v1 }
 0x39b   : > { %1910 = vmatpush1.bf16.msra.mxu0 %v1881_v8 }
 0x409   : > { %v1275_v51 = vpop.f32.mrb[12].mxu0  ;;  %v1437_v52 = vpop.f32.mrb[12].mxu1 }
 0x40a   : > { %v1277_v53 = vpop.f32.mrb[13].mxu0  ;;  %v1439_v54 = vpop.f32.mrb[13].mxu1  ;;  %v1444_v60 = vrot.slane %v1275_v51, 7  ;;  %v1560_v2 = vrot.slane %v1437_v52, 1  ;;  %v2503_v51 = vld [vmem:[%s3518_s8] ss:$0 sm:$0xff] }
 0x40b   : > { %v1278_v55 = vpop.f32.mrb[14].mxu0  ;;  %v1440_v56 = vpop.f32.mrb[14].mxu1 }
 0x40c   : > { %v1279_v57 = vpop.f32.mrb[15].mxu0  ;;  %v1441_v58 = vpop.f32.mrb[15].mxu1  ;;  %v1446_v4 = vsel %vm595_vm5, 0.0, %v1444_v60  ;;  %v1562_v9 = vsel %vm694_vm4, %v1560_v2, 0.0 }
 0x439   : > { %v1553_v5 = vpop.f32.mrb[16].mxu0 }
 0x43a   : > { %v1554_v6 = vadd.f32 %v1553_v5, %v1446_v4  ;;  %v1555_v7 = vpop.f32.mrb[17].mxu0 }
 0x43b   : > { %v1556_v10 = vpop.f32.mrb[18].mxu0 }
 0x43c   : > { %v1563_v12 = vadd.f32 %v1562_v9, %v1554_v6  ;;  %v1557_v13 = vpop.f32.mrb[19].mxu0 }
 0x43e   : > { %v1571_v14 = vadd.f32 %v2400_v11, %v1563_v12 }
 0x440   : > { %v2513_v15 = vpack.c.bf16 %v1571_v14, %v1571_v14 }
 0x442   : > { %1576 = vrot.lane.b32.xlu1 %v2513_v15, %s2773_s14  ;;  %s2093_s14 = sshll.u32 %s325_s29, 4  ;;  %s3470_s14 = int_to_ptr.vmem [resolvable:$true] %s2093_s14 }
 0x443   : > { %s2706_s13 = scalar_lea.vmem %s3470_s14, 128  ;;  %p2713_p0 = scmp.lt.s32.totalorder %s3470_s14, %s2711_s24 }
 0x444   : > { %p2707_p11 = scmp.ne.s32.totalorder %s3470_s14, %s2706_s13 }
 0x446   : > { %p2708_p12 = pnand %p2707_p11, %p2864_p5 }
 0x448   : > { %p2709_p13 = pneg %p2708_p12 }
 0x4b4   : > { %v1577_v16 = vpop.permute.xlu1 %1576 }
 0x4b5   : > { %1580 = vst.msk [vmem:[#allocation2 + $0x4] sm:$0xf] %vm1579_vm10, %v1577_v16 }
 0x4bc   : > { %v1581_v17 = vld [vmem:[#allocation2] sm:$0xff] }
 0x4bd   : > { %v2403_v18 = vcombine.high %v1581_v17, %v1581_v17  ;;  %v2402_v19 = vcombine.low %v1581_v17, %v1581_v17 }
 0x4bf   : > { %2418 = vmatprep.mubr.msk.bf16.mxu1 %vm1696_vm11, %v2403_v18  ;;  %2487 = vmatprep.mubr.msk.bf16.mxu0 %vm1696_vm11, %v2403_v18 }
 0x4c0   : > { %1736 = vmatmul.mubr.bf16.vlgmr.msra.gmra.mrb[16].mxu1 %v2402_v19  ;;  %1916 = vmatmul.mubr.bf16.vlgmr.msra.gmra.mrb[20].mxu0 %v2402_v19 }
 0x4c1   : > { %2012 = vmatpush1.bf16.msra.mxu1 %v2692_v20  ;;  %2502 = vmatprep.mubr.msk.bf16.mxu1 %vm1696_vm11, %v2403_v18 }
 0x4c2   : > { %2013 = vmatprep.subr.bf16.mxu1 %v2770_v1 }
 0x4c5   : > { %2014 = vmatpush1.bf16.msra.mxu1 %v2693_v21 }
 0x4c6   : > { %2015 = vmatprep.subr.bf16.mxu1 %v2770_v1 }
 0x4c9   : > { %2016 = vmatpush1.bf16.msra.mxu1 %v2694_v22 }
 0x4ca   : > { %2017 = vmatprep.subr.bf16.mxu1 %v2770_v1 }
 0x4cd   : > { %2018 = vmatpush1.bf16.msra.mxu1 %v2695_v23 }
 0x4ce   : > { %2019 = vmatprep.subr.bf16.mxu1 %v2770_v1 }
 0x4d1   : > { %2020 = vmatpush1.bf16.msra.mxu1 %v2696_v24 }
 0x4d2   : > { %2021 = vmatprep.subr.bf16.mxu1 %v2770_v1 }
 0x4d5   : > { %2022 = vmatpush1.bf16.msra.mxu1 %v2697_v25 }
 0x4d6   : > { %2023 = vmatprep.subr.bf16.mxu1 %v2770_v1 }
 0x4d9   : > { %2024 = vmatpush1.bf16.msra.mxu1 %v2698_v26 }
 0x4da   : > { %2025 = vmatprep.subr.bf16.mxu1 %v2770_v1 }
 0x4dd   : > { %2026 = vmatpush1.bf16.msra.mxu1 %v2699_v27 }
 0x4de   : > { %2027 = vmatprep.subr.bf16.mxu1 %v2770_v1 }
 0x4e1   : > { %2028 = vmatpush1.bf16.msra.mxu1 %v2700_v28 }
 0x4e2   : > { %2029 = vmatprep.subr.bf16.mxu1 %v2770_v1 }
 0x4e5   : > { %2030 = vmatpush1.bf16.msra.mxu1 %v2701_v29 }
 0x4e6   : > { %2031 = vmatprep.subr.bf16.mxu1 %v2770_v1 }
 0x4e9   : > { %2032 = vmatpush1.bf16.msra.mxu1 %v2702_v30 }
 0x4ea   : > { %2033 = vmatprep.subr.bf16.mxu1 %v2770_v1 }
 0x4ed   : > { %2034 = vmatpush1.bf16.msra.mxu1 %v2703_v31 }
 0x4ee   : > { %2035 = vmatprep.subr.bf16.mxu1 %v2770_v1 }
 0x4f1   : > { %2036 = vmatpush1.bf16.msra.mxu1 %v2704_v32 }
 0x4f2   : > { %2037 = vmatprep.subr.bf16.mxu1 %v2770_v1 }
 0x4f5   : > { %2038 = vmatpush1.bf16.msra.mxu1 %v2009_v34 }
 0x4f8   : > { %2044 = vmatmul.mubr.bf16.vlgmr.msra.gmra.mrb[20].mxu1 %v2402_v19 }
 0x593   : > { %v1737_v35 = vpop.f32.mrb[16].mxu1  ;;  %v1917_v36 = vpop.f32.mrb[20].mxu0 }
 0x594   : > { %v1739_v37 = vpop.f32.mrb[17].mxu1  ;;  %v1919_v38 = vpop.f32.mrb[21].mxu0  ;;  %v1924_v43 = vrot.slane %v1737_v35, 7  ;;  %v2052_v44 = vrot.slane %v1917_v36, 1 }
 0x595   : > { %v1740_v39 = vpop.f32.mrb[18].mxu1  ;;  %v1920_v40 = vpop.f32.mrb[22].mxu0 }
 0x596   : > { %v1741_v41 = vpop.f32.mrb[19].mxu1  ;;  %v1921_v42 = vpop.f32.mrb[23].mxu0  ;;  %v1926_v45 = vsel %vm595_vm5, 0.0, %v1924_v43  ;;  %v2054_v49 = vsel %vm694_vm4, %v2052_v44, 0.0 }
 0x5cb   : > { %v2045_v46 = vpop.f32.mrb[20].mxu1 }
 0x5cc   : > { %v2046_v47 = vadd.f32 %v2045_v46, %v1926_v45  ;;  %v2047_v48 = vpop.f32.mrb[21].mxu1 }
 0x5cd   : > { %v2048_v50 = vpop.f32.mrb[22].mxu1 }
 0x5ce   : > { %v2055_v52 = vadd.f32 %v2054_v49, %v2046_v47  ;;  %v2049_v53 = vpop.f32.mrb[23].mxu1 }
 0x5d0   : > { %v2063_v54 = vadd.f32 %v2503_v51, %v2055_v52 }
 0x5d2   : > { %v2514_v55 = vpack.c.bf16 %v2063_v54, %v2063_v54 }
 0x5d4   : > { %2068 = vrot.lane.b32.xlu1 %v2514_v55, %s2774_s25  ;;  %s2712_s25 = scalar_lea.vmem %s2711_s24, 256 }
 0x5d5   : > { %p2714_p1 = scmp.lt.s32.totalorder %s2712_s25, %s2706_s13 }
 0x5d7   : > { %p2715_p2 = por %p2714_p1, %p2713_p0 }
 0x5d9   : > { %p2716_p3 = pnand %p2715_p2, %p2709_p13 }
 0x646   : > { %v2069_v56 = vpop.permute.xlu1 %2068 }
 0x647   : > { %2072 = vst.msk [vmem:[#allocation2 + $0x4] sm:$0xf] %vm2071_vm12, %v2069_v56 }
 0x64e   : > { %v2073_v57 = vld [vmem:[#allocation2] sm:$0xff] }
 0x64f   : > { %v2074_v58 = vmax.bf16 %v2770_v1, %v2073_v57 }
 0x651   : > { %2077 = vst.msk [vmem:[%s325_s29] sm:$0xff] %vm2076_vm14, %v2074_v58 }
 0x652   : > { %2719 = shalt.err (!%p2716_p3)
}
 0x653   : > { %s2720_s26 = scalar_lea.hbm %s3468_s21, 128  ;;  %s2724_s29 = scalar_lea.hbm %s3519_s9, 256 }
 0x654   : > { %p2721_p4 = scmp.ne.s32.totalorder %s3468_s21, %s2720_s26  ;;  %p2725_p9 = scmp.lt.u32.totalorder %s3468_s21, %s3519_s9 }
 0x655   : > { %p2726_p10 = scmp.lt.u32.totalorder %s2724_s29, %s2720_s26  ;;  %p2728_p12 = scmp.lt.u32.totalorder %s2720_s26, %s3468_s21 }
 0x656   : > { %p2722_p7 = pnand %p2721_p4, %p2864_p5 }
 0x657   : > { %p2727_p11 = por %p2726_p10, %p2725_p9 }
 0x658   : > { %p2723_p8 = pneg %p2722_p7 }
 0x659   : > { %p2729_p13 = por %p2728_p12, %p2727_p11 }
 0x65b   : > { %p2730_p0 = pnand %p2729_p13, %p2723_p8 }
 0x65d   : > { %2733 = shalt.err (!%p2730_p0)
}
 0x65e   : > { %2516 = dma.vmem_to_hbm [thread:$0]  (%p2864_p5), %s3470_s14, 128, %s3468_s21, %s2079_s22  }
 0x65f PF: > { %p2522_p1 = scmp.ge.s32.totalorder %s2768_s12, 2  ;;  %s2105_s13 = sand.u32 1, %s2756_s30  }
 0x660   : > { %s2106_s23 = scalar_lea.sflag [#allocation4], %s2105_s13 }
 0x661   : > { %p2519_p2 = pnand %p2522_p1, %p2868_p6 }
 0x663   : > { %2751 = dma.done.wait (!%p2519_p2), %s2106_s23, 128  }
 0x664   : > { %2753 = vsyncadd (!%p2519_p2), %s2106_s23, 4294967168  ;;  %p19_p3 = scmp.ge.s32.totalorder %s2851_s15, 4   ;;  %s3522_s30 = smov %s2760_s10 }
 0x665   : > { %s3523_s10 = smov %s2764_s11  ;;  %s3524_s11 = smov %s2862_s18 }
 0x666   : > { %s3525_s12 = smov %s2851_s15  ;;  %21 = sbr.rel (!%p19_p3) target bundleno = 3 (0x3), region = 99 }
 0x66d   :  { %2111 = vsyncpa [#allocation4], 1 }
 0x66e   :  { %2113 = vsyncpa [#allocation4 + $0x1], 1 }

</bundles_post_ra>
